<compile_context>
chip_gen: v7x
topology: tpu7x:2x2x1
jax: 0.10.0
libtpu: 0.0.40
codegen_flags: <defaults>
</compile_context>

<pallas_src>
import functools

import jax
import jax.numpy as jnp
from jax.experimental import pallas as pl
from jax.experimental.pallas import tpu as pltpu


def _conv_taps_kernel(x_ref, w_ref, o_ref, *, KH, KW, Wp, TP, SH):
    # x_ref: (C_in, Qin)            bf16  -- whole flattened padded input
    # w_ref: (KH*KW, C_out, C_in)   bf16  -- one (C_out, C_in) slab per tap
    # o_ref: (C_out, TP)            f32   -- one lane-dense pixel tile
    j = pl.program_id(0)
    base = pl.multiple_of(j * TP, 128)
    # One wide load covering this tile plus the largest (kh, kw) shift; every
    # tap below is then a *static* slice of this register tile.
    xt = x_ref[:, pl.ds(base, TP + SH)]                  # (C_in, TP + SH)
    acc = jnp.zeros(o_ref.shape, jnp.float32)
    for kh in range(KH):
        for kw in range(KW):
            s = kh * Wp + kw
            acc += jnp.dot(
                w_ref[kh * KW + kw],                     # (C_out, C_in)
                xt[:, s:s + TP],                         # (C_in, TP)
                preferred_element_type=jnp.float32,
            )
    o_ref[...] = acc
    # TODO(synk): if ConvBlock ever applies bias/activation/pooling in forward,
    # fuse it here (VPU/EUP slots are idle) instead of extra XLA ops.


@functools.partial(jax.jit, static_argnames=("padding",))
def conv_block_forward(x, w, padding=(5, 5)):
    """Forward of ConvBlock: Conv2d (no bias); the module applies no pooling.

    x: (N, C_in, H, W) f32 NCHW;  w: (C_out, C_in, KH, KW) f32 OIHW.
    returns (N, C_out, Ho, Wo) f32 with Ho = H + 2*ph - KH + 1, Wo analogous.
    """
    N, C_in, H, W = x.shape
    C_out, _, KH, KW = w.shape
    ph, pw = padding
    Hp, Wp = H + 2 * ph, W + 2 * pw
    Ho, Wo = Hp - KH + 1, Wp - KW + 1

    # ---- glue on the UN-expanded input (single cheap pass, ~27 KiB here) ----
    xp = jnp.pad(x, ((0, 0), (0, 0), (ph, ph), (pw, pw)))        # (N,C_in,Hp,Wp)
    x2 = xp.transpose(1, 0, 2, 3).reshape(C_in, N * Hp * Wp)     # (C_in, Q)
    Q = N * Hp * Wp

    NT = 2                                     # >=2 parallel tiles => v7x megacore
    TP = pl.cdiv(pl.cdiv(Q, NT), 128) * 128    # large lane-dense pixel tile
    Qout = NT * TP
    max_shift = (KH - 1) * Wp + (KW - 1)
    SH = pl.cdiv(max_shift, 128) * 128         # shift headroom, lane aligned
    Qin = Qout + SH

    x2p = jnp.pad(x2, ((0, 0), (0, Qin - Q))).astype(jnp.bfloat16)
    # (kh*KW + kw, C_out, C_in): each tap is a contiguous (C_out, C_in) slab.
    w3 = (w.transpose(2, 3, 0, 1)
           .reshape(KH * KW, C_out, C_in)
           .astype(jnp.bfloat16))

    kernel = functools.partial(
        _conv_taps_kernel, KH=KH, KW=KW, Wp=Wp, TP=TP, SH=SH)

    out2 = pl.pallas_call(
        kernel,
        out_shape=jax.ShapeDtypeStruct((C_out, Qout), jnp.float32),
        grid_spec=pltpu.PrefetchScalarGridSpec(
            num_scalar_prefetch=0,
            grid=(NT,),
            in_specs=[
                # whole flattened input each step (tiny; revisited block)
                pl.BlockSpec((C_in, Qin), lambda j: (0, 0)),
                pl.BlockSpec((KH * KW, C_out, C_in), lambda j: (0, 0, 0)),
            ],
            out_specs=pl.BlockSpec((C_out, TP), lambda j: (0, j)),
        ),
        compiler_params=pltpu.CompilerParams(
            dimension_semantics=("parallel",),
            # VMEM use here is a few hundred KiB -- far under the scoped limit
            # on every generation.  TODO(synk): at much larger H/W/C derive TP
            # from a VMEM budget (ceiling ~2x smaller on v7x's 64 MiB).
        ),
        cost_estimate=pl.CostEstimate(
            flops=2 * C_out * C_in * KH * KW * Qout,
            transcendentals=0,
            bytes_accessed=(C_in * Qin * 2
                            + KH * KW * C_out * C_in * 2
                            + C_out * Qout * 4),
        ),
    )(x2p, w3)

    # ---- glue back: (C_out, N, Hp, Wp) -> crop valid window -> NCHW ----
    out = (out2[:, :Q]
           .reshape(C_out, N, Hp, Wp)[:, :, :Ho, :Wo]
           .transpose(1, 0, 2, 3))
    return out


if __name__ == "__main__":
    # Shapes consistent with the module: batch=2, in_channels=4, out_channels=8,
    # spatial 16x16, kernel 6x6, padding 5.
    N, C_in, C_out, H, W = 2, 4, 8, 16, 16
    KH, KW = 6, 6

    key = jax.random.PRNGKey(0)
    kx, kw_ = jax.random.split(key)
    x = jax.random.normal(kx, (N, C_in, H, W), dtype=jnp.float32)
    w = 0.05 * jax.random.normal(kw_, (C_out, C_in, KH, KW), dtype=jnp.float32)

    out = conv_block_forward(x, w, padding=(5, 5))
    out = jax.block_until_ready(out)

    # Reference: XLA conv with the same NCHW / OIHW semantics as PyTorch.
    ref = jax.lax.conv_general_dilated(
        x, w, window_strides=(1, 1), padding=((5, 5), (5, 5)),
        dimension_numbers=("NCHW", "OIHW", "NCHW"),
    )
    assert out.shape == ref.shape == (N, C_out, H + 5, W + 5), out.shape
    # bf16 operands / f32 accumulation vs f32 reference -> looser tolerance.
    assert jnp.allclose(out, ref, atol=3e-2, rtol=3e-2), (
        "mismatch vs reference conv, max abs err = "
        + str(float(jnp.max(jnp.abs(out - ref)))))

    print("KERNEL_OK")
</pallas_src>

<mosaic_0001>
module attributes {stable_mosaic.version = 11 : i64} {
  func.func @_conv_taps_kernel(%arg0: i32, %arg1: memref<4x1792xbf16, #tpu.memory_space<vmem>>, %arg2: memref<36x8x4xbf16, #tpu.memory_space<vmem>>, %arg3: memref<8x768xf32, #tpu.memory_space<vmem>>) attributes {dimension_semantics = [#tpu.dimension_semantics<parallel>], iteration_bounds = array<i64: 2>, scalar_prefetch = 0 : i64, scratch_operands = 0 : i64, tpu.core_type = #tpu.core_type<tc>, window_params = [{pipeline_mode = #tpu.pipeline_mode<synchronous>, transform_indices = @transform_0, window_bounds = array<i64: 4, 1792>}, {pipeline_mode = #tpu.pipeline_mode<synchronous>, transform_indices = @transform_1, window_bounds = array<i64: 36, 8, 4>}, {transform_indices = @transform_2, window_bounds = array<i64: 8, 768>}]} {
    %c768_i32 = arith.constant 768 : i32
    %0 = arith.muli %arg0, %c768_i32 : i32
    %1 = tpu.assume_multiple %0, 128 : i32
    %c0 = arith.constant 0 : index
    %2 = arith.index_cast %1 : i32 to index
    %3 = vector.load %arg1[%c0, %2] : memref<4x1792xbf16, #tpu.memory_space<vmem>>, vector<4x1024xbf16>
    %cst = arith.constant 0.000000e+00 : f32
    %4 = vector.broadcast %cst : f32 to vector<8x768xf32>
    %c0_0 = arith.constant 0 : index
    %c0_1 = arith.constant 0 : index
    %c0_2 = arith.constant 0 : index
    %5 = vector.load %arg2[%c0_0, %c0_1, %c0_2] : memref<36x8x4xbf16, #tpu.memory_space<vmem>>, vector<1x8x4xbf16>
    %6 = vector.shape_cast %5 : vector<1x8x4xbf16> to vector<8x4xbf16>
    %7 = vector.extract_strided_slice %3 {offsets = [0, 0], sizes = [4, 768], strides = [1, 1]} : vector<4x1024xbf16> to vector<4x768xbf16>
    %cst_3 = arith.constant dense<0.000000e+00> : vector<8x768xf32>
    %8 = tpu.matmul %6, %7, %cst_3 {dimension_numbers = #tpu.dot_dimension_numbers<[1], [0], [0], [1], [0, 0, 1, 1], [], []>} : vector<8x4xbf16>, vector<4x768xbf16>, vector<8x768xf32> -> vector<8x768xf32>
    %9 = arith.addf %4, %8 : vector<8x768xf32>
    %c1 = arith.constant 1 : index
    %c0_4 = arith.constant 0 : index
    %c0_5 = arith.constant 0 : index
    %10 = vector.load %arg2[%c1, %c0_4, %c0_5] : memref<36x8x4xbf16, #tpu.memory_space<vmem>>, vector<1x8x4xbf16>
    %11 = vector.shape_cast %10 : vector<1x8x4xbf16> to vector<8x4xbf16>
    %12 = vector.extract_strided_slice %3 {offsets = [0, 1], sizes = [4, 768], strides = [1, 1]} : vector<4x1024xbf16> to vector<4x768xbf16>
    %cst_6 = arith.constant dense<0.000000e+00> : vector<8x768xf32>
    %13 = tpu.matmul %11, %12, %cst_6 {dimension_numbers = #tpu.dot_dimension_numbers<[1], [0], [0], [1], [0, 0, 1, 1], [], []>} : vector<8x4xbf16>, vector<4x768xbf16>, vector<8x768xf32> -> vector<8x768xf32>
    %14 = arith.addf %9, %13 : vector<8x768xf32>
    %c2 = arith.constant 2 : index
    %c0_7 = arith.constant 0 : index
    %c0_8 = arith.constant 0 : index
    %15 = vector.load %arg2[%c2, %c0_7, %c0_8] : memref<36x8x4xbf16, #tpu.memory_space<vmem>>, vector<1x8x4xbf16>
    %16 = vector.shape_cast %15 : vector<1x8x4xbf16> to vector<8x4xbf16>
    %17 = vector.extract_strided_slice %3 {offsets = [0, 2], sizes = [4, 768], strides = [1, 1]} : vector<4x1024xbf16> to vector<4x768xbf16>
    %cst_9 = arith.constant dense<0.000000e+00> : vector<8x768xf32>
    %18 = tpu.matmul %16, %17, %cst_9 {dimension_numbers = #tpu.dot_dimension_numbers<[1], [0], [0], [1], [0, 0, 1, 1], [], []>} : vector<8x4xbf16>, vector<4x768xbf16>, vector<8x768xf32> -> vector<8x768xf32>
    %19 = arith.addf %14, %18 : vector<8x768xf32>
    %c3 = arith.constant 3 : index
    %c0_10 = arith.constant 0 : index
    %c0_11 = arith.constant 0 : index
    %20 = vector.load %arg2[%c3, %c0_10, %c0_11] : memref<36x8x4xbf16, #tpu.memory_space<vmem>>, vector<1x8x4xbf16>
    %21 = vector.shape_cast %20 : vector<1x8x4xbf16> to vector<8x4xbf16>
    %22 = vector.extract_strided_slice %3 {offsets = [0, 3], sizes = [4, 768], strides = [1, 1]} : vector<4x1024xbf16> to vector<4x768xbf16>
    %cst_12 = arith.constant dense<0.000000e+00> : vector<8x768xf32>
    %23 = tpu.matmul %21, %22, %cst_12 {dimension_numbers = #tpu.dot_dimension_numbers<[1], [0], [0], [1], [0, 0, 1, 1], [], []>} : vector<8x4xbf16>, vector<4x768xbf16>, vector<8x768xf32> -> vector<8x768xf32>
    %24 = arith.addf %19, %23 : vector<8x768xf32>
    %c4 = arith.constant 4 : index
    %c0_13 = arith.constant 0 : index
    %c0_14 = arith.constant 0 : index
    %25 = vector.load %arg2[%c4, %c0_13, %c0_14] : memref<36x8x4xbf16, #tpu.memory_space<vmem>>, vector<1x8x4xbf16>
    %26 = vector.shape_cast %25 : vector<1x8x4xbf16> to vector<8x4xbf16>
    %27 = vector.extract_strided_slice %3 {offsets = [0, 4], sizes = [4, 768], strides = [1, 1]} : vector<4x1024xbf16> to vector<4x768xbf16>
    %cst_15 = arith.constant dense<0.000000e+00> : vector<8x768xf32>
    %28 = tpu.matmul %26, %27, %cst_15 {dimension_numbers = #tpu.dot_dimension_numbers<[1], [0], [0], [1], [0, 0, 1, 1], [], []>} : vector<8x4xbf16>, vector<4x768xbf16>, vector<8x768xf32> -> vector<8x768xf32>
    %29 = arith.addf %24, %28 : vector<8x768xf32>
    %c5 = arith.constant 5 : index
    %c0_16 = arith.constant 0 : index
    %c0_17 = arith.constant 0 : index
    %30 = vector.load %arg2[%c5, %c0_16, %c0_17] : memref<36x8x4xbf16, #tpu.memory_space<vmem>>, vector<1x8x4xbf16>
    %31 = vector.shape_cast %30 : vector<1x8x4xbf16> to vector<8x4xbf16>
    %32 = vector.extract_strided_slice %3 {offsets = [0, 5], sizes = [4, 768], strides = [1, 1]} : vector<4x1024xbf16> to vector<4x768xbf16>
    %cst_18 = arith.constant dense<0.000000e+00> : vector<8x768xf32>
    %33 = tpu.matmul %31, %32, %cst_18 {dimension_numbers = #tpu.dot_dimension_numbers<[1], [0], [0], [1], [0, 0, 1, 1], [], []>} : vector<8x4xbf16>, vector<4x768xbf16>, vector<8x768xf32> -> vector<8x768xf32>
    %34 = arith.addf %29, %33 : vector<8x768xf32>
    %c6 = arith.constant 6 : index
    %c0_19 = arith.constant 0 : index
    %c0_20 = arith.constant 0 : index
    %35 = vector.load %arg2[%c6, %c0_19, %c0_20] : memref<36x8x4xbf16, #tpu.memory_space<vmem>>, vector<1x8x4xbf16>
    %36 = vector.shape_cast %35 : vector<1x8x4xbf16> to vector<8x4xbf16>
    %37 = vector.extract_strided_slice %3 {offsets = [0, 26], sizes = [4, 768], strides = [1, 1]} : vector<4x1024xbf16> to vector<4x768xbf16>
    %cst_21 = arith.constant dense<0.000000e+00> : vector<8x768xf32>
    %38 = tpu.matmul %36, %37, %cst_21 {dimension_numbers = #tpu.dot_dimension_numbers<[1], [0], [0], [1], [0, 0, 1, 1], [], []>} : vector<8x4xbf16>, vector<4x768xbf16>, vector<8x768xf32> -> vector<8x768xf32>
    %39 = arith.addf %34, %38 : vector<8x768xf32>
    %c7 = arith.constant 7 : index
    %c0_22 = arith.constant 0 : index
    %c0_23 = arith.constant 0 : index
    %40 = vector.load %arg2[%c7, %c0_22, %c0_23] : memref<36x8x4xbf16, #tpu.memory_space<vmem>>, vector<1x8x4xbf16>
    %41 = vector.shape_cast %40 : vector<1x8x4xbf16> to vector<8x4xbf16>
    %42 = vector.extract_strided_slice %3 {offsets = [0, 27], sizes = [4, 768], strides = [1, 1]} : vector<4x1024xbf16> to vector<4x768xbf16>
    %cst_24 = arith.constant dense<0.000000e+00> : vector<8x768xf32>
    %43 = tpu.matmul %41, %42, %cst_24 {dimension_numbers = #tpu.dot_dimension_numbers<[1], [0], [0], [1], [0, 0, 1, 1], [], []>} : vector<8x4xbf16>, vector<4x768xbf16>, vector<8x768xf32> -> vector<8x768xf32>
    %44 = arith.addf %39, %43 : vector<8x768xf32>
    %c8 = arith.constant 8 : index
    %c0_25 = arith.constant 0 : index
    %c0_26 = arith.constant 0 : index
    %45 = vector.load %arg2[%c8, %c0_25, %c0_26] : memref<36x8x4xbf16, #tpu.memory_space<vmem>>, vector<1x8x4xbf16>
    %46 = vector.shape_cast %45 : vector<1x8x4xbf16> to vector<8x4xbf16>
    %47 = vector.extract_strided_slice %3 {offsets = [0, 28], sizes = [4, 768], strides = [1, 1]} : vector<4x1024xbf16> to vector<4x768xbf16>
    %cst_27 = arith.constant dense<0.000000e+00> : vector<8x768xf32>
    %48 = tpu.matmul %46, %47, %cst_27 {dimension_numbers = #tpu.dot_dimension_numbers<[1], [0], [0], [1], [0, 0, 1, 1], [], []>} : vector<8x4xbf16>, vector<4x768xbf16>, vector<8x768xf32> -> vector<8x768xf32>
    %49 = arith.addf %44, %48 : vector<8x768xf32>
    %c9 = arith.constant 9 : index
    %c0_28 = arith.constant 0 : index
    %c0_29 = arith.constant 0 : index
    %50 = vector.load %arg2[%c9, %c0_28, %c0_29] : memref<36x8x4xbf16, #tpu.memory_space<vmem>>, vector<1x8x4xbf16>
    %51 = vector.shape_cast %50 : vector<1x8x4xbf16> to vector<8x4xbf16>
    %52 = vector.extract_strided_slice %3 {offsets = [0, 29], sizes = [4, 768], strides = [1, 1]} : vector<4x1024xbf16> to vector<4x768xbf16>
    %cst_30 = arith.constant dense<0.000000e+00> : vector<8x768xf32>
    %53 = tpu.matmul %51, %52, %cst_30 {dimension_numbers = #tpu.dot_dimension_numbers<[1], [0], [0], [1], [0, 0, 1, 1], [], []>} : vector<8x4xbf16>, vector<4x768xbf16>, vector<8x768xf32> -> vector<8x768xf32>
    %54 = arith.addf %49, %53 : vector<8x768xf32>
    %c10 = arith.constant 10 : index
    %c0_31 = arith.constant 0 : index
    %c0_32 = arith.constant 0 : index
    %55 = vector.load %arg2[%c10, %c0_31, %c0_32] : memref<36x8x4xbf16, #tpu.memory_space<vmem>>, vector<1x8x4xbf16>
    %56 = vector.shape_cast %55 : vector<1x8x4xbf16> to vector<8x4xbf16>
    %57 = vector.extract_strided_slice %3 {offsets = [0, 30], sizes = [4, 768], strides = [1, 1]} : vector<4x1024xbf16> to vector<4x768xbf16>
    %cst_33 = arith.constant dense<0.000000e+00> : vector<8x768xf32>
    %58 = tpu.matmul %56, %57, %cst_33 {dimension_numbers = #tpu.dot_dimension_numbers<[1], [0], [0], [1], [0, 0, 1, 1], [], []>} : vector<8x4xbf16>, vector<4x768xbf16>, vector<8x768xf32> -> vector<8x768xf32>
    %59 = arith.addf %54, %58 : vector<8x768xf32>
    %c11 = arith.constant 11 : index
    %c0_34 = arith.constant 0 : index
    %c0_35 = arith.constant 0 : index
    %60 = vector.load %arg2[%c11, %c0_34, %c0_35] : memref<36x8x4xbf16, #tpu.memory_space<vmem>>, vector<1x8x4xbf16>
    %61 = vector.shape_cast %60 : vector<1x8x4xbf16> to vector<8x4xbf16>
    %62 = vector.extract_strided_slice %3 {offsets = [0, 31], sizes = [4, 768], strides = [1, 1]} : vector<4x1024xbf16> to vector<4x768xbf16>
    %cst_36 = arith.constant dense<0.000000e+00> : vector<8x768xf32>
    %63 = tpu.matmul %61, %62, %cst_36 {dimension_numbers = #tpu.dot_dimension_numbers<[1], [0], [0], [1], [0, 0, 1, 1], [], []>} : vector<8x4xbf16>, vector<4x768xbf16>, vector<8x768xf32> -> vector<8x768xf32>
    %64 = arith.addf %59, %63 : vector<8x768xf32>
    %c12 = arith.constant 12 : index
    %c0_37 = arith.constant 0 : index
    %c0_38 = arith.constant 0 : index
    %65 = vector.load %arg2[%c12, %c0_37, %c0_38] : memref<36x8x4xbf16, #tpu.memory_space<vmem>>, vector<1x8x4xbf16>
    %66 = vector.shape_cast %65 : vector<1x8x4xbf16> to vector<8x4xbf16>
    %67 = vector.extract_strided_slice %3 {offsets = [0, 52], sizes = [4, 768], strides = [1, 1]} : vector<4x1024xbf16> to vector<4x768xbf16>
    %cst_39 = arith.constant dense<0.000000e+00> : vector<8x768xf32>
    %68 = tpu.matmul %66, %67, %cst_39 {dimension_numbers = #tpu.dot_dimension_numbers<[1], [0], [0], [1], [0, 0, 1, 1], [], []>} : vector<8x4xbf16>, vector<4x768xbf16>, vector<8x768xf32> -> vector<8x768xf32>
    %69 = arith.addf %64, %68 : vector<8x768xf32>
    %c13 = arith.constant 13 : index
    %c0_40 = arith.constant 0 : index
    %c0_41 = arith.constant 0 : index
    %70 = vector.load %arg2[%c13, %c0_40, %c0_41] : memref<36x8x4xbf16, #tpu.memory_space<vmem>>, vector<1x8x4xbf16>
    %71 = vector.shape_cast %70 : vector<1x8x4xbf16> to vector<8x4xbf16>
    %72 = vector.extract_strided_slice %3 {offsets = [0, 53], sizes = [4, 768], strides = [1, 1]} : vector<4x1024xbf16> to vector<4x768xbf16>
    %cst_42 = arith.constant dense<0.000000e+00> : vector<8x768xf32>
    %73 = tpu.matmul %71, %72, %cst_42 {dimension_numbers = #tpu.dot_dimension_numbers<[1], [0], [0], [1], [0, 0, 1, 1], [], []>} : vector<8x4xbf16>, vector<4x768xbf16>, vector<8x768xf32> -> vector<8x768xf32>
    %74 = arith.addf %69, %73 : vector<8x768xf32>
    %c14 = arith.constant 14 : index
    %c0_43 = arith.constant 0 : index
    %c0_44 = arith.constant 0 : index
    %75 = vector.load %arg2[%c14, %c0_43, %c0_44] : memref<36x8x4xbf16, #tpu.memory_space<vmem>>, vector<1x8x4xbf16>
    %76 = vector.shape_cast %75 : vector<1x8x4xbf16> to vector<8x4xbf16>
    %77 = vector.extract_strided_slice %3 {offsets = [0, 54], sizes = [4, 768], strides = [1, 1]} : vector<4x1024xbf16> to vector<4x768xbf16>
    %cst_45 = arith.constant dense<0.000000e+00> : vector<8x768xf32>
    %78 = tpu.matmul %76, %77, %cst_45 {dimension_numbers = #tpu.dot_dimension_numbers<[1], [0], [0], [1], [0, 0, 1, 1], [], []>} : vector<8x4xbf16>, vector<4x768xbf16>, vector<8x768xf32> -> vector<8x768xf32>
    %79 = arith.addf %74, %78 : vector<8x768xf32>
    %c15 = arith.constant 15 : index
    %c0_46 = arith.constant 0 : index
    %c0_47 = arith.constant 0 : index
    %80 = vector.load %arg2[%c15, %c0_46, %c0_47] : memref<36x8x4xbf16, #tpu.memory_space<vmem>>, vector<1x8x4xbf16>
    %81 = vector.shape_cast %80 : vector<1x8x4xbf16> to vector<8x4xbf16>
    %82 = vector.extract_strided_slice %3 {offsets = [0, 55], sizes = [4, 768], strides = [1, 1]} : vector<4x1024xbf16> to vector<4x768xbf16>
    %cst_48 = arith.constant dense<0.000000e+00> : vector<8x768xf32>
    %83 = tpu.matmul %81, %82, %cst_48 {dimension_numbers = #tpu.dot_dimension_numbers<[1], [0], [0], [1], [0, 0, 1, 1], [], []>} : vector<8x4xbf16>, vector<4x768xbf16>, vector<8x768xf32> -> vector<8x768xf32>
    %84 = arith.addf %79, %83 : vector<8x768xf32>
    %c16 = arith.constant 16 : index
    %c0_49 = arith.constant 0 : index
    %c0_50 = arith.constant 0 : index
    %85 = vector.load %arg2[%c16, %c0_49, %c0_50] : memref<36x8x4xbf16, #tpu.memory_space<vmem>>, vector<1x8x4xbf16>
    %86 = vector.shape_cast %85 : vector<1x8x4xbf16> to vector<8x4xbf16>
    %87 = vector.extract_strided_slice %3 {offsets = [0, 56], sizes = [4, 768], strides = [1, 1]} : vector<4x1024xbf16> to vector<4x768xbf16>
    %cst_51 = arith.constant dense<0.000000e+00> : vector<8x768xf32>
    %88 = tpu.matmul %86, %87, %cst_51 {dimension_numbers = #tpu.dot_dimension_numbers<[1], [0], [0], [1], [0, 0, 1, 1], [], []>} : vector<8x4xbf16>, vector<4x768xbf16>, vector<8x768xf32> -> vector<8x768xf32>
    %89 = arith.addf %84, %88 : vector<8x768xf32>
    %c17 = arith.constant 17 : index
    %c0_52 = arith.constant 0 : index
    %c0_53 = arith.constant 0 : index
    %90 = vector.load %arg2[%c17, %c0_52, %c0_53] : memref<36x8x4xbf16, #tpu.memory_space<vmem>>, vector<1x8x4xbf16>
    %91 = vector.shape_cast %90 : vector<1x8x4xbf16> to vector<8x4xbf16>
    %92 = vector.extract_strided_slice %3 {offsets = [0, 57], sizes = [4, 768], strides = [1, 1]} : vector<4x1024xbf16> to vector<4x768xbf16>
    %cst_54 = arith.constant dense<0.000000e+00> : vector<8x768xf32>
    %93 = tpu.matmul %91, %92, %cst_54 {dimension_numbers = #tpu.dot_dimension_numbers<[1], [0], [0], [1], [0, 0, 1, 1], [], []>} : vector<8x4xbf16>, vector<4x768xbf16>, vector<8x768xf32> -> vector<8x768xf32>
    %94 = arith.addf %89, %93 : vector<8x768xf32>
    %c18 = arith.constant 18 : index
    %c0_55 = arith.constant 0 : index
    %c0_56 = arith.constant 0 : index
    %95 = vector.load %arg2[%c18, %c0_55, %c0_56] : memref<36x8x4xbf16, #tpu.memory_space<vmem>>, vector<1x8x4xbf16>
    %96 = vector.shape_cast %95 : vector<1x8x4xbf16> to vector<8x4xbf16>
    %97 = vector.extract_strided_slice %3 {offsets = [0, 78], sizes = [4, 768], strides = [1, 1]} : vector<4x1024xbf16> to vector<4x768xbf16>
    %cst_57 = arith.constant dense<0.000000e+00> : vector<8x768xf32>
    %98 = tpu.matmul %96, %97, %cst_57 {dimension_numbers = #tpu.dot_dimension_numbers<[1], [0], [0], [1], [0, 0, 1, 1], [], []>} : vector<8x4xbf16>, vector<4x768xbf16>, vector<8x768xf32> -> vector<8x768xf32>
    %99 = arith.addf %94, %98 : vector<8x768xf32>
    %c19 = arith.constant 19 : index
    %c0_58 = arith.constant 0 : index
    %c0_59 = arith.constant 0 : index
    %100 = vector.load %arg2[%c19, %c0_58, %c0_59] : memref<36x8x4xbf16, #tpu.memory_space<vmem>>, vector<1x8x4xbf16>
    %101 = vector.shape_cast %100 : vector<1x8x4xbf16> to vector<8x4xbf16>
    %102 = vector.extract_strided_slice %3 {offsets = [0, 79], sizes = [4, 768], strides = [1, 1]} : vector<4x1024xbf16> to vector<4x768xbf16>
    %cst_60 = arith.constant dense<0.000000e+00> : vector<8x768xf32>
    %103 = tpu.matmul %101, %102, %cst_60 {dimension_numbers = #tpu.dot_dimension_numbers<[1], [0], [0], [1], [0, 0, 1, 1], [], []>} : vector<8x4xbf16>, vector<4x768xbf16>, vector<8x768xf32> -> vector<8x768xf32>
    %104 = arith.addf %99, %103 : vector<8x768xf32>
    %c20 = arith.constant 20 : index
    %c0_61 = arith.constant 0 : index
    %c0_62 = arith.constant 0 : index
    %105 = vector.load %arg2[%c20, %c0_61, %c0_62] : memref<36x8x4xbf16, #tpu.memory_space<vmem>>, vector<1x8x4xbf16>
    %106 = vector.shape_cast %105 : vector<1x8x4xbf16> to vector<8x4xbf16>
    %107 = vector.extract_strided_slice %3 {offsets = [0, 80], sizes = [4, 768], strides = [1, 1]} : vector<4x1024xbf16> to vector<4x768xbf16>
    %cst_63 = arith.constant dense<0.000000e+00> : vector<8x768xf32>
    %108 = tpu.matmul %106, %107, %cst_63 {dimension_numbers = #tpu.dot_dimension_numbers<[1], [0], [0], [1], [0, 0, 1, 1], [], []>} : vector<8x4xbf16>, vector<4x768xbf16>, vector<8x768xf32> -> vector<8x768xf32>
    %109 = arith.addf %104, %108 : vector<8x768xf32>
    %c21 = arith.constant 21 : index
    %c0_64 = arith.constant 0 : index
    %c0_65 = arith.constant 0 : index
    %110 = vector.load %arg2[%c21, %c0_64, %c0_65] : memref<36x8x4xbf16, #tpu.memory_space<vmem>>, vector<1x8x4xbf16>
    %111 = vector.shape_cast %110 : vector<1x8x4xbf16> to vector<8x4xbf16>
    %112 = vector.extract_strided_slice %3 {offsets = [0, 81], sizes = [4, 768], strides = [1, 1]} : vector<4x1024xbf16> to vector<4x768xbf16>
    %cst_66 = arith.constant dense<0.000000e+00> : vector<8x768xf32>
    %113 = tpu.matmul %111, %112, %cst_66 {dimension_numbers = #tpu.dot_dimension_numbers<[1], [0], [0], [1], [0, 0, 1, 1], [], []>} : vector<8x4xbf16>, vector<4x768xbf16>, vector<8x768xf32> -> vector<8x768xf32>
    %114 = arith.addf %109, %113 : vector<8x768xf32>
    %c22 = arith.constant 22 : index
    %c0_67 = arith.constant 0 : index
    %c0_68 = arith.constant 0 : index
    %115 = vector.load %arg2[%c22, %c0_67, %c0_68] : memref<36x8x4xbf16, #tpu.memory_space<vmem>>, vector<1x8x4xbf16>
    %116 = vector.shape_cast %115 : vector<1x8x4xbf16> to vector<8x4xbf16>
    %117 = vector.extract_strided_slice %3 {offsets = [0, 82], sizes = [4, 768], strides = [1, 1]} : vector<4x1024xbf16> to vector<4x768xbf16>
    %cst_69 = arith.constant dense<0.000000e+00> : vector<8x768xf32>
    %118 = tpu.matmul %116, %117, %cst_69 {dimension_numbers = #tpu.dot_dimension_numbers<[1], [0], [0], [1], [0, 0, 1, 1], [], []>} : vector<8x4xbf16>, vector<4x768xbf16>, vector<8x768xf32> -> vector<8x768xf32>
    %119 = arith.addf %114, %118 : vector<8x768xf32>
    %c23 = arith.constant 23 : index
    %c0_70 = arith.constant 0 : index
    %c0_71 = arith.constant 0 : index
    %120 = vector.load %arg2[%c23, %c0_70, %c0_71] : memref<36x8x4xbf16, #tpu.memory_space<vmem>>, vector<1x8x4xbf16>
    %121 = vector.shape_cast %120 : vector<1x8x4xbf16> to vector<8x4xbf16>
    %122 = vector.extract_strided_slice %3 {offsets = [0, 83], sizes = [4, 768], strides = [1, 1]} : vector<4x1024xbf16> to vector<4x768xbf16>
    %cst_72 = arith.constant dense<0.000000e+00> : vector<8x768xf32>
    %123 = tpu.matmul %121, %122, %cst_72 {dimension_numbers = #tpu.dot_dimension_numbers<[1], [0], [0], [1], [0, 0, 1, 1], [], []>} : vector<8x4xbf16>, vector<4x768xbf16>, vector<8x768xf32> -> vector<8x768xf32>
    %124 = arith.addf %119, %123 : vector<8x768xf32>
    %c24 = arith.constant 24 : index
    %c0_73 = arith.constant 0 : index
    %c0_74 = arith.constant 0 : index
    %125 = vector.load %arg2[%c24, %c0_73, %c0_74] : memref<36x8x4xbf16, #tpu.memory_space<vmem>>, vector<1x8x4xbf16>
    %126 = vector.shape_cast %125 : vector<1x8x4xbf16> to vector<8x4xbf16>
    %127 = vector.extract_strided_slice %3 {offsets = [0, 104], sizes = [4, 768], strides = [1, 1]} : vector<4x1024xbf16> to vector<4x768xbf16>
    %cst_75 = arith.constant dense<0.000000e+00> : vector<8x768xf32>
    %128 = tpu.matmul %126, %127, %cst_75 {dimension_numbers = #tpu.dot_dimension_numbers<[1], [0], [0], [1], [0, 0, 1, 1], [], []>} : vector<8x4xbf16>, vector<4x768xbf16>, vector<8x768xf32> -> vector<8x768xf32>
    %129 = arith.addf %124, %128 : vector<8x768xf32>
    %c25 = arith.constant 25 : index
    %c0_76 = arith.constant 0 : index
    %c0_77 = arith.constant 0 : index
    %130 = vector.load %arg2[%c25, %c0_76, %c0_77] : memref<36x8x4xbf16, #tpu.memory_space<vmem>>, vector<1x8x4xbf16>
    %131 = vector.shape_cast %130 : vector<1x8x4xbf16> to vector<8x4xbf16>
    %132 = vector.extract_strided_slice %3 {offsets = [0, 105], sizes = [4, 768], strides = [1, 1]} : vector<4x1024xbf16> to vector<4x768xbf16>
    %cst_78 = arith.constant dense<0.000000e+00> : vector<8x768xf32>
    %133 = tpu.matmul %131, %132, %cst_78 {dimension_numbers = #tpu.dot_dimension_numbers<[1], [0], [0], [1], [0, 0, 1, 1], [], []>} : vector<8x4xbf16>, vector<4x768xbf16>, vector<8x768xf32> -> vector<8x768xf32>
    %134 = arith.addf %129, %133 : vector<8x768xf32>
    %c26 = arith.constant 26 : index
    %c0_79 = arith.constant 0 : index
    %c0_80 = arith.constant 0 : index
    %135 = vector.load %arg2[%c26, %c0_79, %c0_80] : memref<36x8x4xbf16, #tpu.memory_space<vmem>>, vector<1x8x4xbf16>
    %136 = vector.shape_cast %135 : vector<1x8x4xbf16> to vector<8x4xbf16>
    %137 = vector.extract_strided_slice %3 {offsets = [0, 106], sizes = [4, 768], strides = [1, 1]} : vector<4x1024xbf16> to vector<4x768xbf16>
    %cst_81 = arith.constant dense<0.000000e+00> : vector<8x768xf32>
    %138 = tpu.matmul %136, %137, %cst_81 {dimension_numbers = #tpu.dot_dimension_numbers<[1], [0], [0], [1], [0, 0, 1, 1], [], []>} : vector<8x4xbf16>, vector<4x768xbf16>, vector<8x768xf32> -> vector<8x768xf32>
    %139 = arith.addf %134, %138 : vector<8x768xf32>
    %c27 = arith.constant 27 : index
    %c0_82 = arith.constant 0 : index
    %c0_83 = arith.constant 0 : index
    %140 = vector.load %arg2[%c27, %c0_82, %c0_83] : memref<36x8x4xbf16, #tpu.memory_space<vmem>>, vector<1x8x4xbf16>
    %141 = vector.shape_cast %140 : vector<1x8x4xbf16> to vector<8x4xbf16>
    %142 = vector.extract_strided_slice %3 {offsets = [0, 107], sizes = [4, 768], strides = [1, 1]} : vector<4x1024xbf16> to vector<4x768xbf16>
    %cst_84 = arith.constant dense<0.000000e+00> : vector<8x768xf32>
    %143 = tpu.matmul %141, %142, %cst_84 {dimension_numbers = #tpu.dot_dimension_numbers<[1], [0], [0], [1], [0, 0, 1, 1], [], []>} : vector<8x4xbf16>, vector<4x768xbf16>, vector<8x768xf32> -> vector<8x768xf32>
    %144 = arith.addf %139, %143 : vector<8x768xf32>
    %c28 = arith.constant 28 : index
    %c0_85 = arith.constant 0 : index
    %c0_86 = arith.constant 0 : index
    %145 = vector.load %arg2[%c28, %c0_85, %c0_86] : memref<36x8x4xbf16, #tpu.memory_space<vmem>>, vector<1x8x4xbf16>
    %146 = vector.shape_cast %145 : vector<1x8x4xbf16> to vector<8x4xbf16>
    %147 = vector.extract_strided_slice %3 {offsets = [0, 108], sizes = [4, 768], strides = [1, 1]} : vector<4x1024xbf16> to vector<4x768xbf16>
    %cst_87 = arith.constant dense<0.000000e+00> : vector<8x768xf32>
    %148 = tpu.matmul %146, %147, %cst_87 {dimension_numbers = #tpu.dot_dimension_numbers<[1], [0], [0], [1], [0, 0, 1, 1], [], []>} : vector<8x4xbf16>, vector<4x768xbf16>, vector<8x768xf32> -> vector<8x768xf32>
    %149 = arith.addf %144, %148 : vector<8x768xf32>
    %c29 = arith.constant 29 : index
    %c0_88 = arith.constant 0 : index
    %c0_89 = arith.constant 0 : index
    %150 = vector.load %arg2[%c29, %c0_88, %c0_89] : memref<36x8x4xbf16, #tpu.memory_space<vmem>>, vector<1x8x4xbf16>
    %151 = vector.shape_cast %150 : vector<1x8x4xbf16> to vector<8x4xbf16>
    %152 = vector.extract_strided_slice %3 {offsets = [0, 109], sizes = [4, 768], strides = [1, 1]} : vector<4x1024xbf16> to vector<4x768xbf16>
    %cst_90 = arith.constant dense<0.000000e+00> : vector<8x768xf32>
    %153 = tpu.matmul %151, %152, %cst_90 {dimension_numbers = #tpu.dot_dimension_numbers<[1], [0], [0], [1], [0, 0, 1, 1], [], []>} : vector<8x4xbf16>, vector<4x768xbf16>, vector<8x768xf32> -> vector<8x768xf32>
    %154 = arith.addf %149, %153 : vector<8x768xf32>
    %c30 = arith.constant 30 : index
    %c0_91 = arith.constant 0 : index
    %c0_92 = arith.constant 0 : index
    %155 = vector.load %arg2[%c30, %c0_91, %c0_92] : memref<36x8x4xbf16, #tpu.memory_space<vmem>>, vector<1x8x4xbf16>
    %156 = vector.shape_cast %155 : vector<1x8x4xbf16> to vector<8x4xbf16>
    %157 = vector.extract_strided_slice %3 {offsets = [0, 130], sizes = [4, 768], strides = [1, 1]} : vector<4x1024xbf16> to vector<4x768xbf16>
    %cst_93 = arith.constant dense<0.000000e+00> : vector<8x768xf32>
    %158 = tpu.matmul %156, %157, %cst_93 {dimension_numbers = #tpu.dot_dimension_numbers<[1], [0], [0], [1], [0, 0, 1, 1], [], []>} : vector<8x4xbf16>, vector<4x768xbf16>, vector<8x768xf32> -> vector<8x768xf32>
    %159 = arith.addf %154, %158 : vector<8x768xf32>
    %c31 = arith.constant 31 : index
    %c0_94 = arith.constant 0 : index
    %c0_95 = arith.constant 0 : index
    %160 = vector.load %arg2[%c31, %c0_94, %c0_95] : memref<36x8x4xbf16, #tpu.memory_space<vmem>>, vector<1x8x4xbf16>
    %161 = vector.shape_cast %160 : vector<1x8x4xbf16> to vector<8x4xbf16>
    %162 = vector.extract_strided_slice %3 {offsets = [0, 131], sizes = [4, 768], strides = [1, 1]} : vector<4x1024xbf16> to vector<4x768xbf16>
    %cst_96 = arith.constant dense<0.000000e+00> : vector<8x768xf32>
    %163 = tpu.matmul %161, %162, %cst_96 {dimension_numbers = #tpu.dot_dimension_numbers<[1], [0], [0], [1], [0, 0, 1, 1], [], []>} : vector<8x4xbf16>, vector<4x768xbf16>, vector<8x768xf32> -> vector<8x768xf32>
    %164 = arith.addf %159, %163 : vector<8x768xf32>
    %c32 = arith.constant 32 : index
    %c0_97 = arith.constant 0 : index
    %c0_98 = arith.constant 0 : index
    %165 = vector.load %arg2[%c32, %c0_97, %c0_98] : memref<36x8x4xbf16, #tpu.memory_space<vmem>>, vector<1x8x4xbf16>
    %166 = vector.shape_cast %165 : vector<1x8x4xbf16> to vector<8x4xbf16>
    %167 = vector.extract_strided_slice %3 {offsets = [0, 132], sizes = [4, 768], strides = [1, 1]} : vector<4x1024xbf16> to vector<4x768xbf16>
    %cst_99 = arith.constant dense<0.000000e+00> : vector<8x768xf32>
    %168 = tpu.matmul %166, %167, %cst_99 {dimension_numbers = #tpu.dot_dimension_numbers<[1], [0], [0], [1], [0, 0, 1, 1], [], []>} : vector<8x4xbf16>, vector<4x768xbf16>, vector<8x768xf32> -> vector<8x768xf32>
    %169 = arith.addf %164, %168 : vector<8x768xf32>
    %c33 = arith.constant 33 : index
    %c0_100 = arith.constant 0 : index
    %c0_101 = arith.constant 0 : index
    %170 = vector.load %arg2[%c33, %c0_100, %c0_101] : memref<36x8x4xbf16, #tpu.memory_space<vmem>>, vector<1x8x4xbf16>
    %171 = vector.shape_cast %170 : vector<1x8x4xbf16> to vector<8x4xbf16>
    %172 = vector.extract_strided_slice %3 {offsets = [0, 133], sizes = [4, 768], strides = [1, 1]} : vector<4x1024xbf16> to vector<4x768xbf16>
    %cst_102 = arith.constant dense<0.000000e+00> : vector<8x768xf32>
    %173 = tpu.matmul %171, %172, %cst_102 {dimension_numbers = #tpu.dot_dimension_numbers<[1], [0], [0], [1], [0, 0, 1, 1], [], []>} : vector<8x4xbf16>, vector<4x768xbf16>, vector<8x768xf32> -> vector<8x768xf32>
    %174 = arith.addf %169, %173 : vector<8x768xf32>
    %c34 = arith.constant 34 : index
    %c0_103 = arith.constant 0 : index
    %c0_104 = arith.constant 0 : index
    %175 = vector.load %arg2[%c34, %c0_103, %c0_104] : memref<36x8x4xbf16, #tpu.memory_space<vmem>>, vector<1x8x4xbf16>
    %176 = vector.shape_cast %175 : vector<1x8x4xbf16> to vector<8x4xbf16>
    %177 = vector.extract_strided_slice %3 {offsets = [0, 134], sizes = [4, 768], strides = [1, 1]} : vector<4x1024xbf16> to vector<4x768xbf16>
    %cst_105 = arith.constant dense<0.000000e+00> : vector<8x768xf32>
    %178 = tpu.matmul %176, %177, %cst_105 {dimension_numbers = #tpu.dot_dimension_numbers<[1], [0], [0], [1], [0, 0, 1, 1], [], []>} : vector<8x4xbf16>, vector<4x768xbf16>, vector<8x768xf32> -> vector<8x768xf32>
    %179 = arith.addf %174, %178 : vector<8x768xf32>
    %c35 = arith.constant 35 : index
    %c0_106 = arith.constant 0 : index
    %c0_107 = arith.constant 0 : index
    %180 = vector.load %arg2[%c35, %c0_106, %c0_107] : memref<36x8x4xbf16, #tpu.memory_space<vmem>>, vector<1x8x4xbf16>
    %181 = vector.shape_cast %180 : vector<1x8x4xbf16> to vector<8x4xbf16>
    %182 = vector.extract_strided_slice %3 {offsets = [0, 135], sizes = [4, 768], strides = [1, 1]} : vector<4x1024xbf16> to vector<4x768xbf16>
    %cst_108 = arith.constant dense<0.000000e+00> : vector<8x768xf32>
    %183 = tpu.matmul %181, %182, %cst_108 {dimension_numbers = #tpu.dot_dimension_numbers<[1], [0], [0], [1], [0, 0, 1, 1], [], []>} : vector<8x4xbf16>, vector<4x768xbf16>, vector<8x768xf32> -> vector<8x768xf32>
    %184 = arith.addf %179, %183 : vector<8x768xf32>
    %c0_109 = arith.constant 0 : index
    %c0_110 = arith.constant 0 : index
    %185 = vector.load %arg3[%c0_109, %c0_110] : memref<8x768xf32, #tpu.memory_space<vmem>>, vector<8x768xf32>
    tpu.vector_store %arg3[%c0_109, %c0_110], %184 {strides = array<i32>} : memref<8x768xf32, #tpu.memory_space<vmem>>, vector<8x768xf32>,
    return
  }
  func.func @transform_0(%arg0: i32) -> (i32, i32) {
    %c0_i32 = arith.constant 0 : i32
    %c0_i32_0 = arith.constant 0 : i32
    %c0_i32_1 = arith.constant 0 : i32
    return %c0_i32, %c0_i32_0 : i32, i32
  }
  func.func @transform_1(%arg0: i32) -> (i32, i32, i32) {
    %c0_i32 = arith.constant 0 : i32
    %c0_i32_0 = arith.constant 0 : i32
    %c0_i32_1 = arith.constant 0 : i32
    %c0_i32_2 = arith.constant 0 : i32
    return %c0_i32, %c0_i32_0, %c0_i32_1 : i32, i32, i32
  }
  func.func @transform_2(%arg0: i32) -> (i32, i32) {
    %c0_i32 = arith.constant 0 : i32
    %c0_i32_0 = arith.constant 0 : i32
    return %c0_i32, %arg0 : i32, i32
  }
}

</mosaic_0001>

<bundles_post_ra>
// kernel: conv_block_forward.1
= control target key start
LH: loop header
LB: loop body
LE: loop exit
PB: predicated region body
PF: predicated region fallthrough
CT: control target
= control target key end

     0   :  { %s7059_s9 = smov 0   ;;  %s8828_s0 = inlined_call_operand.vmem [shape: bf16[4,1792], index: 0, kind: input, shape index: {}]   ;;  %s8829_s1 = inlined_call_operand.vmem [shape: bf16[36,8,4], index: 1, kind: input, shape index: {}]   ;;  %s8830_s2 = inlined_call_operand.vmem [shape: f32[8,1536], index: 2, kind: output, shape index: {}]  }
   0x1 LB: > { %s6285_s10 = sadd.s32 4294967295, %s7009_s9   ;;  %p6288_p0 = scmp.ge.s32.totalorder %s7009_s9, 1  ;;  %s7009_s9 = sphi %s7059_s9, %s12_s9  }
   0x2   : > { %p102_p1 = scmp.lt.s32.totalorder %s7009_s9, 3 }
   0x4   : > { %p103_p2 = pnand %p6288_p0, %p102_p1 }
   0x6   : > { %106 = sbr.rel (%p103_p2) target bundleno = 889 (0x379), region = 28 }
   0xd   : > { %s126_s11 = smul.u32 768, %s6285_s10  ;;  %v142_v0 = vlaneseq  ;;  %v7011_v1 = vmov 1983009808   ;;  %v8832_v5 = vmov 0   ;;  %s7013_s17 = smov 127   ;;  %vm185_vm0 = vcmask 1039360  }
   0xe   : > { %v140_v2 = vunpack.c.l.s4 %v7011_v1  ;;  %247 = vmatprep.mubr.bf16.mxu1 %v8832_v5  ;;  %1769 = vmatprep.mubr.bf16.mxu0 %v8832_v5  ;;  %s7014_s18 = smov 126   ;;  %s7015_s19 = smov 125   ;;  %vm196_vm1 = vcmask 1041408   ;;  %v6291_v25 = vld [vmem:[%s8829_s1 + $0x4] sm:$0xf]  ;;  %vm192_vm2 = vcmask 31744  }
   0xf   : > { %s127_s12 = sshra.s32 %s126_s11, 7  ;;  %v143_v3 = vshrl.u32 %v142_v0, 7  ;;  %s7016_s20 = smov 124   ;;  %v133_v45 = vld [vmem:[%s8829_s1] sm:$0xf]  ;;  %vm498_vm3 = vcmask 1031168  }
  0x10   : > { %s6290_s13 = sshll.u32 %s127_s12, 1  ;;  %v141_v4 = vunpack.c.0.s8 %v140_v2  ;;  %s7017_s21 = smov 99   ;;  %vm1709_vm4 = vcmask 809984   ;;  %vm671_vm5 = vcmask 1022976   ;;  %vm1882_vm6 = vcmask 801792  }
  0x11   : > { %s130_s16 = scalar_lea.vmem %s8828_s0, %s6290_s13  ;;  %s7018_s22 = smov 98   ;;  %vm844_vm7 = vcmask 1014784   ;;  %vm2055_vm8 = vcmask 793600   ;;  %vm2228_vm9 = vcmask 621568   ;;  %vm1017_vm10 = vcmask 1006592  }
  0x12   : > { %v131_v6 = vld [vmem:[%s130_s16] sm:$0xff]  ;;  %v144_v7 = vsub.s32 %v141_v4, %v143_v3  ;;  %v132_v9 = vld [vmem:[%s130_s16 + $0x8] sm:$0xff]  ;;  %s7019_s23 = smov 123   ;;  %s7020_s24 = smov 97   ;;  %vm2401_vm11 = vcmask 613376   ;;  %vm1190_vm12 = vcmask 834560  }
  0x13   : > { %v138_v8 = vcombine.high %v131_v6, %v131_v6  ;;  %v155_v15 = vcombine.high %v132_v9, %v132_v9  ;;  %s7021_s25 = smov 102   ;;  %s7022_s26 = smov 76   ;;  %v6304_v4 = vld [vmem:[%s8829_s1 + $0x8] sm:$0xf]  ;;  %vm2574_vm13 = vcmask 605184   ;;  %vm1363_vm14 = vcmask 826368  }
  0x14   : > { %v7074_v10 = vrot.slane %v131_v6, %v144_v7  ;;  %v7083_v13 = vrot.slane %v132_v9, %v144_v7  ;;  %s7023_s29 = smov 75   ;;  %s7024_s30 = smov 101   ;;  %v7378_v9 = vld [vmem:[%s8829_s1 + $0x24] sm:$0xf]  ;;  %vm2747_vm15 = vcmask 596992  }
  0x15   : > { %v7076_v11 = vrot.slane %v138_v8, %v144_v7  ;;  %v7096_v17 = vrot.slane %v155_v15, %v144_v7  ;;  %s7025_s5 = smov 74   ;;  %s7026_s6 = smov 100  }
  0x16   : > { %171 = vrot.lane.b32.xlu0 %v7074_v10, %s7013_s17  ;;  %v7081_v12 = vcombine.high %v7074_v10, %v7074_v10  ;;  %v7094_v16 = vcombine.high %v7083_v13, %v7083_v13  ;;  %v342_v41 = vsel %vm196_vm1, %v7074_v10, 0  ;;  %v354_v52 = vsel %vm196_vm1, %v7083_v13, 0  ;;  %s7027_s13 = smov 73   ;;  %s7030_s3 = smov 50  }
  0x17   : > { %175 = vrot.lane.b32.xlu1 %v7076_v11, %s7013_s17  ;;  %v7088_v14 = vcombine.high %v7076_v11, %v7076_v11  ;;  %v348_v47 = vsel %vm196_vm1, %v7076_v11, 0  ;;  %s7031_s4 = smov 49   ;;  %s7033_s14 = smov 47  }
  0x18   : > { %s7034_s16 = smov 46   ;;  %s7035_s28 = smov 45  }
  0x19   : > { %s7039_s11 = smov 21   ;;  %s119_s27 = smul.u32 6, %s6285_s10 }
  0x1a   : > { %173 = vrot.lane.b32.xlu0 %v7081_v12, %s7013_s17 }
  0x1b   : > { %177 = vrot.lane.b32.xlu1 %v7088_v14, %s7013_s17  ;;  %p120_p3 = scmp.lt.s32.totalorder %s119_s27, 11 }
  0x1d   : > { %s8847_s27 = smov (!%p120_p3, %s119_s27), 11 }
  0x1e   : > { %179 = vrot.lane.b32.xlu0 %v7083_v13, %s7013_s17 }
  0x1f   : > { %181 = vrot.lane.b32.xlu1 %v7094_v16, %s7013_s17 }
  0x22   : > { %183 = vrot.lane.b32.xlu0 %v7096_v17, %s7013_s17  ;;  %s7041_s17 = smov 19  }
  0x23   : > { %484 = vrot.lane.b32.xlu1 %v7074_v10, %s7014_s18 }
  0x26   : > { %486 = vrot.lane.b32.xlu0 %v7081_v12, %s7014_s18 }
  0x27   : > { %488 = vrot.lane.b32.xlu1 %v7076_v11, %s7014_s18 }
  0x2a   : > { %490 = vrot.lane.b32.xlu0 %v7088_v14, %s7014_s18 }
  0x2b   : > { %492 = vrot.lane.b32.xlu1 %v7083_v13, %s7014_s18 }
  0x2e   : > { %494 = vrot.lane.b32.xlu0 %v7094_v16, %s7014_s18 }
  0x2f   : > { %496 = vrot.lane.b32.xlu1 %v7096_v17, %s7014_s18 }
  0x32   : > { %657 = vrot.lane.b32.xlu0 %v7074_v10, %s7015_s19 }
  0x33   : > { %659 = vrot.lane.b32.xlu1 %v7081_v12, %s7015_s19 }
  0x36   : > { %661 = vrot.lane.b32.xlu0 %v7076_v11, %s7015_s19 }
  0x37   : > { %663 = vrot.lane.b32.xlu1 %v7088_v14, %s7015_s19 }
  0x3a   : > { %665 = vrot.lane.b32.xlu0 %v7083_v13, %s7015_s19 }
  0x3b   : > { %667 = vrot.lane.b32.xlu1 %v7094_v16, %s7015_s19 }
  0x3e   : > { %669 = vrot.lane.b32.xlu0 %v7096_v17, %s7015_s19 }
  0x3f   : > { %830 = vrot.lane.b32.xlu1 %v7074_v10, %s7016_s20 }
  0x42   : > { %832 = vrot.lane.b32.xlu0 %v7081_v12, %s7016_s20 }
  0x43   : > { %834 = vrot.lane.b32.xlu1 %v7076_v11, %s7016_s20 }
  0x46   : > { %1695 = vrot.lane.b32.xlu0 %v7074_v10, %s7017_s21 }
  0x47   : > { %1697 = vrot.lane.b32.xlu1 %v7081_v12, %s7017_s21 }
  0x4a   : > { %1699 = vrot.lane.b32.xlu0 %v7076_v11, %s7017_s21 }
  0x4b   : > { %836 = vrot.lane.b32.xlu1 %v7088_v14, %s7016_s20 }
  0x4e   : > { %838 = vrot.lane.b32.xlu0 %v7083_v13, %s7016_s20 }
  0x4f   : > { %1703 = vrot.lane.b32.xlu1 %v7083_v13, %s7017_s21 }
  0x52   : > { %1705 = vrot.lane.b32.xlu0 %v7094_v16, %s7017_s21 }
  0x53   : > { %1707 = vrot.lane.b32.xlu1 %v7096_v17, %s7017_s21 }
  0x56   : > { %840 = vrot.lane.b32.xlu0 %v7094_v16, %s7016_s20 }
  0x57   : > { %842 = vrot.lane.b32.xlu1 %v7096_v17, %s7016_s20 }
  0x5a   : > { %1868 = vrot.lane.b32.xlu0 %v7074_v10, %s7018_s22 }
  0x5b   : > { %1870 = vrot.lane.b32.xlu1 %v7081_v12, %s7018_s22 }
  0x5e   : > { %1872 = vrot.lane.b32.xlu0 %v7076_v11, %s7018_s22 }
  0x5f   : > { %1003 = vrot.lane.b32.xlu1 %v7074_v10, %s7019_s23 }
  0x62   : > { %1005 = vrot.lane.b32.xlu0 %v7081_v12, %s7019_s23 }
  0x63   : > { %1007 = vrot.lane.b32.xlu1 %v7076_v11, %s7019_s23 }
  0x66   : > { %1876 = vrot.lane.b32.xlu0 %v7083_v13, %s7018_s22 }
  0x67   : > { %1878 = vrot.lane.b32.xlu1 %v7094_v16, %s7018_s22 }
  0x6a   : > { %1880 = vrot.lane.b32.xlu0 %v7096_v17, %s7018_s22 }
  0x6b   : > { %1009 = vrot.lane.b32.xlu1 %v7088_v14, %s7019_s23 }
  0x6e   : > { %1011 = vrot.lane.b32.xlu0 %v7083_v13, %s7019_s23 }
  0x6f   : > { %2041 = vrot.lane.b32.xlu1 %v7074_v10, %s7020_s24 }
  0x72   : > { %2043 = vrot.lane.b32.xlu0 %v7081_v12, %s7020_s24 }
  0x73   : > { %2045 = vrot.lane.b32.xlu1 %v7076_v11, %s7020_s24 }
  0x76   : > { %1013 = vrot.lane.b32.xlu0 %v7094_v16, %s7019_s23 }
  0x77   : > { %1015 = vrot.lane.b32.xlu1 %v7096_v17, %s7019_s23 }
  0x7a   : > { %2049 = vrot.lane.b32.xlu0 %v7083_v13, %s7020_s24 }
  0x7b   : > { %2051 = vrot.lane.b32.xlu1 %v7094_v16, %s7020_s24 }
  0x7e   : > { %2053 = vrot.lane.b32.xlu0 %v7096_v17, %s7020_s24 }
  0x7f   : > { %1176 = vrot.lane.b32.xlu1 %v7074_v10, %s7021_s25 }
  0x82   : > { %1178 = vrot.lane.b32.xlu0 %v7081_v12, %s7021_s25 }
  0x83   : > { %1180 = vrot.lane.b32.xlu1 %v7076_v11, %s7021_s25 }
  0x86   : > { %2214 = vrot.lane.b32.xlu0 %v7074_v10, %s7022_s26 }
  0x87   : > { %2216 = vrot.lane.b32.xlu1 %v7081_v12, %s7022_s26 }
  0x88   : > { %v172_v18 = vpop.permute.xlu0 %171 }
  0x89   : > { %v176_v19 = vpop.permute.xlu1 %175 }
  0x8a   : > { %2218 = vrot.lane.b32.xlu0 %v7076_v11, %s7022_s26 }
  0x8b   : > { %1182 = vrot.lane.b32.xlu1 %v7088_v14, %s7021_s25 }
  0x8c   : > { %v174_v20 = vpop.permute.xlu0 %173 }
  0x8d   : > { %v178_v21 = vpop.permute.xlu1 %177  ;;  %v187_v22 = vsel %vm185_vm0, %v174_v20, %v176_v19  ;;  %v186_v23 = vsel %vm185_vm0, %v172_v18, %v174_v20 }
  0x8e   : > { %6292 = vmatprep.subr.msk.bf16.mxu1 %vm196_vm1, %v187_v22  ;;  %1184 = vrot.lane.b32.xlu0 %v7083_v13, %s7021_s25  ;;  %v198_v24 = vsel %vm196_vm1, %v186_v23, 0  ;;  %v188_v26 = vsel %vm185_vm0, %v176_v19, %v178_v21 }
  0x8f   : > { %216 = vmatpush1.bf16.msra.mxu1 %v198_v24  ;;  %2222 = vrot.lane.b32.xlu1 %v7083_v13, %s7022_s26  ;;  %v204_v30 = vsel %vm196_vm1, %v188_v26, 0 }
  0x90   : > { %v180_v27 = vpop.permute.xlu0 %179 }
  0x91   : > { %v182_v28 = vpop.permute.xlu1 %181  ;;  %v189_v29 = vsel %vm185_vm0, %v178_v21, %v180_v27 }
  0x92   : > { %6293 = vmatmul.mubr.msk.bf16.vlgmr.msra.gmra.mrb[0].mxu1 %vm192_vm2, %v6291_v25  ;;  %2224 = vrot.lane.b32.xlu0 %v7094_v16, %s7022_s26  ;;  %v190_v34 = vsel %vm185_vm0, %v180_v27, %v182_v28 }
  0x93   : > { %6294 = vmatprep.subr.msk.bf16.mxu1 %vm196_vm1, %v189_v29  ;;  %2226 = vrot.lane.b32.xlu1 %v7096_v17, %s7022_s26  ;;  %v210_v37 = vsel %vm196_vm1, %v190_v34, 0 }
  0x94   : > { %257 = vmatpush1.bf16.msra.mxu1 %v204_v30  ;;  %v184_v31 = vpop.permute.xlu0 %183  ;;  %288 = vmatprep.mubr.bf16.mxu1 %v8832_v5 }
  0x95   : > { %v191_v32 = vsel %vm185_vm0, %v182_v28, %v184_v31  ;;  %v7229_v33 = vpop.permute.xlu1 %484  ;;  %vm1536_vm0 = vcmask 818176  }
  0x96   : > { %1186 = vrot.lane.b32.xlu0 %v7094_v16, %s7021_s25  ;;  %6296 = vmatprep.subr.msk.bf16.mxu1 %vm196_vm1, %v191_v32 }
  0x97   : > { %1188 = vrot.lane.b32.xlu1 %v7096_v17, %s7021_s25  ;;  %s7028_s25 = smov 72  }
  0x98   : > { %v487_v35 = vpop.permute.xlu0 %486 }
  0x99   : > { %v7237_v36 = vpop.permute.xlu1 %488  ;;  %v499_v57 = vsel %vm498_vm3, %v7229_v33, %v487_v35 }
  0x9a   : > { %2387 = vrot.lane.b32.xlu0 %v7074_v10, %s7023_s29  ;;  %6295 = vmatmul.mubr.msk.bf16.vlgmr.msra.gmra.mrb[4].mxu1 %vm192_vm2, %v6291_v25  ;;  %v7316_v54 = vsel %vm498_vm3, %v487_v35, %v7237_v36  ;;  %v509_v60 = vsel %vm196_vm1, %v499_v57, 0 }
  0x9b   : > { %298 = vmatpush1.bf16.msra.mxu1 %v210_v37  ;;  %2389 = vrot.lane.b32.xlu1 %v7081_v12, %s7023_s29 }
  0x9c   : > { %v7245_v38 = vpop.permute.xlu0 %490  ;;  %329 = vmatprep.mubr.bf16.mxu1 %v8832_v5  ;;  %6298 = vmatprep.subr.msk.bf16.mxu1 %vm196_vm1, %v7081_v12 }
  0x9d   : > { %v7250_v39 = vpop.permute.xlu1 %492  ;;  %v7359_v3 = vsel %vm498_vm3, %v7237_v36, %v7245_v38 }
  0x9e   : > { %2391 = vrot.lane.b32.xlu0 %v7076_v11, %s7023_s29  ;;  %v7341_v62 = vsel %vm498_vm3, %v7245_v38, %v7250_v39  ;;  %v515_v8 = vsel %vm196_vm1, %v7359_v3, 0 }
  0x9f   : > { %1349 = vrot.lane.b32.xlu1 %v7074_v10, %s7024_s30 }
  0xa0   : > { %v7256_v40 = vpop.permute.xlu0 %494 }
  0xa1   : > { %v7260_v42 = vpop.permute.xlu1 %496  ;;  %v7402_v23 = vsel %vm498_vm3, %v7250_v39, %v7256_v40 }
  0xa2   : > { %1351 = vrot.lane.b32.xlu0 %v7081_v12, %s7024_s30  ;;  %6297 = vmatmul.mubr.msk.bf16.vlgmr.msra.gmra.mrb[8].mxu1 %vm192_vm2, %v6291_v25  ;;  %v7385_v15 = vsel %vm498_vm3, %v7256_v40, %v7260_v42  ;;  %v521_v26 = vsel %vm196_vm1, %v7402_v23, 0  ;;  %v7468_v40 = vld [vmem:[%s8829_s1 + $0x28] sm:$0xf] }
  0xa3   : > { %1353 = vrot.lane.b32.xlu1 %v7076_v11, %s7024_s30  ;;  %360 = vmatpush1.bf16.msra.mxu1 %v342_v41 }
  0xa4   : > { %v7267_v43 = vpop.permute.xlu0 %657  ;;  %391 = vmatprep.mubr.bf16.mxu1 %v8832_v5  ;;  %6300 = vmatprep.subr.msk.bf16.mxu1 %vm196_vm1, %v7088_v14 }
  0xa5   : > { %v7272_v44 = vpop.permute.xlu1 %659 }
  0xa6   : > { %2395 = vrot.lane.b32.xlu0 %v7083_v13, %s7023_s29  ;;  %v672_v30 = vsel %vm671_vm5, %v7267_v43, %v7272_v44  ;;  %v6311_v43 = vld [vmem:[%s8829_s1 + $0xc] sm:$0xf] }
  0xa7   : > { %2397 = vrot.lane.b32.xlu1 %v7094_v16, %s7023_s29  ;;  %v682_v34 = vsel %vm196_vm1, %v672_v30, 0 }
  0xa8   : > { %v7281_v46 = vpop.permute.xlu0 %661 }
  0xa9   : > { %v7285_v48 = vpop.permute.xlu1 %663  ;;  %v7421_v27 = vsel %vm671_vm5, %v7272_v44, %v7281_v46 }
  0xaa   : > { %2399 = vrot.lane.b32.xlu0 %v7096_v17, %s7023_s29  ;;  %6299 = vmatmul.mubr.msk.bf16.vlgmr.msra.gmra.mrb[0].mxu1 %vm192_vm2, %v133_v45  ;;  %v7473_v41 = vsel %vm671_vm5, %v7281_v46, %v7285_v48 }
  0xab   : > { %1355 = vrot.lane.b32.xlu1 %v7088_v14, %s7024_s30  ;;  %401 = vmatpush1.bf16.msra.mxu1 %v348_v47  ;;  %v688_v46 = vsel %vm196_vm1, %v7473_v41, 0 }
  0xac   : > { %v7292_v49 = vpop.permute.xlu0 %665  ;;  %432 = vmatprep.mubr.bf16.mxu1 %v8832_v5  ;;  %6302 = vmatprep.subr.msk.bf16.mxu1 %vm196_vm1, %v7094_v16 }
  0xad   : > { %v7297_v50 = vpop.permute.xlu1 %667  ;;  %v7452_v36 = vsel %vm671_vm5, %v7285_v48, %v7292_v49 }
  0xae   : > { %1357 = vrot.lane.b32.xlu0 %v7083_v13, %s7024_s30 }
  0xaf   : > { %2560 = vrot.lane.b32.xlu1 %v7074_v10, %s7025_s5 }
  0xb0   : > { %v7303_v51 = vpop.permute.xlu0 %669 }
  0xb1   : > { %v7307_v53 = vpop.permute.xlu1 %830  ;;  %v7496_v48 = vsel %vm671_vm5, %v7297_v50, %v7303_v51 }
  0xb2   : > { %2562 = vrot.lane.b32.xlu0 %v7081_v12, %s7025_s5  ;;  %6301 = vmatmul.mubr.msk.bf16.vlgmr.msra.gmra.mrb[4].mxu1 %vm192_vm2, %v133_v45 }
  0xb3   : > { %442 = vmatpush1.bf16.msra.mxu1 %v354_v52  ;;  %2564 = vrot.lane.b32.xlu1 %v7076_v11, %s7025_s5 }
  0xb4   : > { %6305 = vmatprep.subr.msk.bf16.mxu1 %vm196_vm1, %v7316_v54  ;;  %v7320_v55 = vpop.permute.xlu0 %832  ;;  %473 = vmatprep.mubr.bf16.mxu1 %v8832_v5 }
  0xb5   : > { %v7323_v56 = vpop.permute.xlu1 %834 }
  0xb6   : > { %1359 = vrot.lane.b32.xlu0 %v7094_v16, %s7024_s30 }
  0xb7   : > { %1361 = vrot.lane.b32.xlu1 %v7096_v17, %s7024_s30 }
  0xb8   : > { %v1696_v58 = vpop.permute.xlu0 %1695 }
  0xb9   : > { %v1698_v59 = vpop.permute.xlu1 %1697 }
  0xba   : > { %2568 = vrot.lane.b32.xlu0 %v7083_v13, %s7025_s5  ;;  %6303 = vmatmul.mubr.msk.bf16.vlgmr.msra.gmra.mrb[8].mxu1 %vm192_vm2, %v133_v45  ;;  %v1710_v61 = vsel %vm1709_vm4, %v1696_v58, %v1698_v59 }
  0xbb   : > { %527 = vmatpush1.bf16.msra.mxu1 %v509_v60  ;;  %2570 = vrot.lane.b32.xlu1 %v7094_v16, %s7025_s5  ;;  %v1720_v0 = vsel %vm196_vm1, %v1710_v61, 0  ;;  %v7512_v60 = vsel %vm671_vm5, %v7292_v49, %v7297_v50  ;;  %v7528_v49 = vsel %vm844_vm7, %v7320_v55, %v7323_v56 }
  0xbc   : > { %6307 = vmatprep.subr.msk.bf16.mxu1 %vm196_vm1, %v7341_v62  ;;  %v7345_v63 = vpop.permute.xlu0 %1699  ;;  %558 = vmatprep.mubr.bf16.mxu1 %v8832_v5 }
  0xbd   : > { %v7349_v1 = vpop.permute.xlu1 %836  ;;  %v1711_v2 = vsel %vm1709_vm4, %v1698_v59, %v7345_v63 }
  0xbe   : > { %2572 = vrot.lane.b32.xlu0 %v7096_v17, %s7025_s5  ;;  %6354 = vmatprep.subr.msk.bf16.mxu0 %vm196_vm1, %v1711_v2  ;;  %v694_v2 = vsel %vm196_vm1, %v7512_v60, 0  ;;  %v7583_v30 = vsel %vm844_vm7, %v7323_v56, %v7349_v1 }
  0xbf   : > { %1522 = vrot.lane.b32.xlu1 %v7074_v10, %s7026_s6  ;;  %1738 = vmatpush1.bf16.msra.mxu0 %v1720_v0  ;;  %v861_v56 = vsel %vm196_vm1, %v7583_v30, 0 }
  0xc0   : > { %v7366_v6 = vpop.permute.xlu0 %838 }
  0xc1   : > { %v7368_v7 = vpop.permute.xlu1 %1703 }
  0xc2   : > { %1524 = vrot.lane.b32.xlu0 %v7081_v12, %s7026_s6  ;;  %6306 = vmatmul.mubr.msk.bf16.vlgmr.msra.gmra.mrb[0].mxu1 %vm192_vm2, %v6304_v4 }
  0xc3   : > { %568 = vmatpush1.bf16.msra.mxu1 %v515_v8  ;;  %1526 = vrot.lane.b32.xlu1 %v7076_v11, %s7026_s6 }
  0xc4   : > { %6309 = vmatprep.subr.msk.bf16.mxu1 %vm196_vm1, %v7385_v15  ;;  %v1706_v18 = vpop.permute.xlu0 %1705  ;;  %599 = vmatprep.mubr.bf16.mxu1 %v8832_v5 }
  0xc5   : > { %v1714_v19 = vsel %vm1709_vm4, %v7368_v7, %v1706_v18  ;;  %v1708_v20 = vpop.permute.xlu1 %1707  ;;  %6355 = vmatmul.mubr.msk.bf16.vlgmr.msra.gmra.mrb[0].mxu0 %vm192_vm2, %v7378_v9 }
  0xc6   : > { %v1715_v21 = vsel %vm1709_vm4, %v1706_v18, %v1708_v20  ;;  %2733 = vrot.lane.b32.xlu0 %v7074_v10, %s7027_s13  ;;  %v1732_v22 = vsel %vm196_vm1, %v1714_v19, 0  ;;  %1851 = vmatprep.mubr.bf16.mxu0 %v8832_v5  ;;  %v845_v20 = vsel %vm844_vm7, %v7307_v53, %v7320_v55  ;;  %v7561_v53 = vld [vmem:[%s8829_s1 + $0x2c] sm:$0xf]  ;;  %v7568_v55 = vsel %vm844_vm7, %v7349_v1, %v7366_v6 }
  0xc7   : > { %2735 = vrot.lane.b32.xlu1 %v7081_v12, %s7027_s13  ;;  %6358 = vmatprep.subr.msk.bf16.mxu0 %vm196_vm1, %v1715_v21  ;;  %8837 = vst [vmem:[#allocation2_spill] sm:$0xff] %v7568_v55 }
  0xc8   : > { %v7407_v24 = vpop.permute.xlu0 %840  ;;  %1820 = vmatpush1.bf16.msra.mxu0 %v1732_v22 }
  0xc9   : > { %v7409_v25 = vpop.permute.xlu1 %842 }
  0xca   : > { %2737 = vrot.lane.b32.xlu0 %v7076_v11, %s7027_s13  ;;  %6308 = vmatmul.mubr.msk.bf16.vlgmr.msra.gmra.mrb[4].mxu1 %vm192_vm2, %v6304_v4  ;;  %v7605_v1 = vsel %vm844_vm7, %v7407_v24, %v7409_v25 }
  0xcb   : > { %609 = vmatpush1.bf16.msra.mxu1 %v521_v26  ;;  %1528 = vrot.lane.b32.xlu1 %v7088_v14, %s7026_s6  ;;  %v855_v26 = vsel %vm196_vm1, %v845_v20, 0 }
  0xcc   : > { %6312 = vmatprep.subr.msk.bf16.mxu1 %vm196_vm1, %v7421_v27  ;;  %v1869_v28 = vpop.permute.xlu0 %1868  ;;  %640 = vmatprep.mubr.bf16.mxu1 %v8832_v5 }
  0xcd   : > { %v1871_v29 = vpop.permute.xlu1 %1870  ;;  %6359 = vmatmul.mubr.msk.bf16.vlgmr.msra.gmra.mrb[4].mxu0 %vm192_vm2, %v7378_v9 }
  0xce   : > { %1530 = vrot.lane.b32.xlu0 %v7083_v13, %s7026_s6  ;;  %1942 = vmatprep.mubr.bf16.mxu0 %v8832_v5  ;;  %v1883_v31 = vsel %vm1882_vm6, %v1869_v28, %v1871_v29 }
  0xcf   : > { %2741 = vrot.lane.b32.xlu1 %v7083_v13, %s7027_s13  ;;  %v1893_v37 = vsel %vm196_vm1, %v1883_v31, 0  ;;  %v6318_v31 = vld [vmem:[%s8829_s1 + $0x10] sm:$0xf] }
  0xd0   : > { %v7437_v32 = vpop.permute.xlu0 %1872 }
  0xd1   : > { %v7439_v33 = vpop.permute.xlu1 %1003  ;;  %v1884_v35 = vsel %vm1882_vm6, %v1871_v29, %v7437_v32 }
  0xd2   : > { %2743 = vrot.lane.b32.xlu0 %v7094_v16, %s7027_s13  ;;  %6310 = vmatmul.mubr.msk.bf16.vlgmr.msra.gmra.mrb[8].mxu1 %vm192_vm2, %v6304_v4 }
  0xd3   : > { %700 = vmatpush1.bf16.msra.mxu1 %v682_v34  ;;  %2745 = vrot.lane.b32.xlu1 %v7096_v17, %s7027_s13 }
  0xd4   : > { %6314 = vmatprep.subr.msk.bf16.mxu1 %vm196_vm1, %v7452_v36  ;;  %v7457_v38 = vpop.permute.xlu0 %1005  ;;  %731 = vmatprep.mubr.bf16.mxu1 %v8832_v5 }
  0xd5   : > { %v7460_v39 = vpop.permute.xlu1 %1007  ;;  %6361 = vmatprep.subr.msk.bf16.mxu0 %vm196_vm1, %v1884_v35 }
  0xd6   : > { %1532 = vrot.lane.b32.xlu0 %v7094_v16, %s7026_s6  ;;  %1911 = vmatpush1.bf16.msra.mxu0 %v1893_v37 }
  0xd7   : > { %1534 = vrot.lane.b32.xlu1 %v7096_v17, %s7026_s6 }
  0xd8   : > { %v7480_v44 = vpop.permute.xlu0 %1876 }
  0xd9   : > { %v1879_v45 = vpop.permute.xlu1 %1878  ;;  %6362 = vmatmul.mubr.msk.bf16.vlgmr.msra.gmra.mrb[0].mxu0 %vm192_vm2, %v7468_v40 }
  0xda   : > { %v1887_v47 = vsel %vm1882_vm6, %v7480_v44, %v1879_v45  ;;  %2906 = vrot.lane.b32.xlu0 %v7074_v10, %s7028_s25  ;;  %6313 = vmatmul.mubr.msk.bf16.vlgmr.msra.gmra.mrb[0].mxu1 %vm192_vm2, %v6311_v43 }
  0xdb   : > { %741 = vmatpush1.bf16.msra.mxu1 %v688_v46  ;;  %2908 = vrot.lane.b32.xlu1 %v7081_v12, %s7028_s25  ;;  %v1905_v57 = vsel %vm196_vm1, %v1887_v47, 0 }
  0xdc   : > { %6316 = vmatprep.subr.msk.bf16.mxu1 %vm196_vm1, %v7496_v48  ;;  %v1881_v52 = vpop.permute.xlu0 %1880  ;;  %772 = vmatprep.mubr.bf16.mxu1 %v8832_v5 }
  0xdd   : > { %v1888_v58 = vsel %vm1882_vm6, %v1879_v45, %v1881_v52  ;;  %v7503_v59 = vpop.permute.xlu1 %1009  ;;  %2024 = vmatprep.mubr.bf16.mxu0 %v8832_v5  ;;  %v7621_v52 = vsel %vm844_vm7, %v7366_v6, %v7407_v24  ;;  %v7638_v24 = vsel %vm1017_vm10, %v7457_v38, %v7460_v39 }
  0xde   : > { %2910 = vrot.lane.b32.xlu0 %v7076_v11, %s7028_s25  ;;  %6365 = vmatprep.subr.msk.bf16.mxu0 %vm196_vm1, %v1888_v58  ;;  %8838 = vst [vmem:[#allocation3_spill] sm:$0xff] %v7621_v52  ;;  %v867_v6 = vsel %vm196_vm1, %v7621_v52, 0 }
  0xdf   : > { %1701 = vrot.lane.b32.xlu1 %v7088_v14, %s7017_s21  ;;  %1993 = vmatpush1.bf16.msra.mxu0 %v1905_v57  ;;  %s7029_s21 = smov 71  }
  0xe0   : > { %v7516_v61 = vpop.permute.xlu0 %1011 }
  0xe1   : > { %v2042_v0 = vpop.permute.xlu1 %2041 }
  0xe2   : > { %2914 = vrot.lane.b32.xlu0 %v7083_v13, %s7028_s25  ;;  %6315 = vmatmul.mubr.msk.bf16.vlgmr.msra.gmra.mrb[4].mxu1 %vm192_vm2, %v6311_v43 }
  0xe3   : > { %782 = vmatpush1.bf16.msra.mxu1 %v694_v2  ;;  %2916 = vrot.lane.b32.xlu1 %v7094_v16, %s7028_s25 }
  0xe4   : > { %6319 = vmatprep.subr.msk.bf16.mxu1 %vm196_vm1, %v7528_v49  ;;  %v2044_v50 = vpop.permute.xlu0 %2043  ;;  %813 = vmatprep.mubr.bf16.mxu1 %v8832_v5 }
  0xe5   : > { %v2056_v4 = vsel %vm2055_vm8, %v2042_v0, %v2044_v50  ;;  %v7534_v8 = vpop.permute.xlu1 %2045  ;;  %6366 = vmatmul.mubr.msk.bf16.vlgmr.msra.gmra.mrb[4].mxu0 %vm192_vm2, %v7468_v40 }
  0xe6   : > { %2918 = vrot.lane.b32.xlu0 %v7096_v17, %s7028_s25  ;;  %v2057_v18 = vsel %vm2055_vm8, %v2044_v50, %v7534_v8  ;;  %v2066_v19 = vsel %vm196_vm1, %v2056_v4, 0  ;;  %2115 = vmatprep.mubr.bf16.mxu0 %v8832_v5 }
  0xe7   : > { %1874 = vrot.lane.b32.xlu1 %v7088_v14, %s7018_s22  ;;  %6368 = vmatprep.subr.msk.bf16.mxu0 %vm196_vm1, %v2057_v18  ;;  %s7036_s22 = smov 24  }
  0xe8   : > { %v7550_v21 = vpop.permute.xlu0 %1013  ;;  %2084 = vmatpush1.bf16.msra.mxu0 %v2066_v19  ;;  %v1018_v19 = vsel %vm1017_vm10, %v7439_v33, %v7457_v38  ;;  %v7677_v33 = vsel %vm1017_vm10, %v7503_v59, %v7516_v61 }
  0xe9   : > { %v7552_v22 = vpop.permute.xlu1 %1015  ;;  %8839 = vst [vmem:[#allocation4_spill] sm:$0xff] %v7677_v33 }
  0xea   : > { %3079 = vrot.lane.b32.xlu0 %v7074_v10, %s7029_s21  ;;  %6317 = vmatmul.mubr.msk.bf16.vlgmr.msra.gmra.mrb[8].mxu1 %vm192_vm2, %v6311_v43 }
  0xeb   : > { %873 = vmatpush1.bf16.msra.mxu1 %v855_v26  ;;  %3081 = vrot.lane.b32.xlu1 %v7081_v12, %s7029_s21 }
  0xec   : > { %6321 = vmatprep.subr.msk.bf16.mxu1 %vm196_vm1, %v7568_v55  ;;  %v7572_v28 = vpop.permute.xlu0 %2049  ;;  %904 = vmatprep.mubr.bf16.mxu1 %v8832_v5 }
  0xed   : > { %v2052_v29 = vpop.permute.xlu1 %2051  ;;  %6369 = vmatmul.mubr.msk.bf16.vlgmr.msra.gmra.mrb[0].mxu0 %vm192_vm2, %v7561_v53 }
  0xee   : > { %3083 = vrot.lane.b32.xlu0 %v7076_v11, %s7029_s21  ;;  %2197 = vmatprep.mubr.bf16.mxu0 %v8832_v5  ;;  %v2060_v34 = vsel %vm2055_vm8, %v7572_v28, %v2052_v29 }
  0xef   : > { %3087 = vrot.lane.b32.xlu1 %v7083_v13, %s7029_s21  ;;  %v2078_v45 = vsel %vm196_vm1, %v2060_v34, 0  ;;  %v7670_v34 = vld [vmem:[%s8829_s1 + $0x30] sm:$0xf] }
  0xf0   : > { %v2054_v35 = vpop.permute.xlu0 %2053 }
  0xf1   : > { %v7592_v37 = vpop.permute.xlu1 %1176  ;;  %v2061_v43 = vsel %vm2055_vm8, %v2052_v29, %v2054_v35  ;;  %v1028_v29 = vsel %vm196_vm1, %v1018_v19, 0 }
  0xf2   : > { %3089 = vrot.lane.b32.xlu0 %v7094_v16, %s7029_s21  ;;  %6320 = vmatmul.mubr.msk.bf16.vlgmr.msra.gmra.mrb[0].mxu1 %vm192_vm2, %v6318_v31 }
  0xf3   : > { %914 = vmatpush1.bf16.msra.mxu1 %v861_v56  ;;  %3091 = vrot.lane.b32.xlu1 %v7096_v17, %s7029_s21 }
  0xf4   : > { %6323 = vmatprep.subr.msk.bf16.mxu1 %vm196_vm1, %v7605_v1  ;;  %v7610_v47 = vpop.permute.xlu0 %1178  ;;  %945 = vmatprep.mubr.bf16.mxu1 %v8832_v5 }
  0xf5   : > { %v7613_v46 = vpop.permute.xlu1 %1180  ;;  %6372 = vmatprep.subr.msk.bf16.mxu0 %vm196_vm1, %v2061_v43 }
  0xf6   : > { %2047 = vrot.lane.b32.xlu0 %v7088_v14, %s7020_s24  ;;  %2166 = vmatpush1.bf16.msra.mxu0 %v2078_v45  ;;  %v7694_v45 = vsel %vm1017_vm10, %v7460_v39, %v7503_v59  ;;  %v7716_v59 = vsel %vm1017_vm10, %v7550_v21, %v7552_v22 }
  0xf7   : > { %3252 = vrot.lane.b32.xlu1 %v7074_v10, %s7030_s3  ;;  %v1034_v39 = vsel %vm196_vm1, %v7694_v45, 0 }
  0xf8   : > { %v2215_v57 = vpop.permute.xlu0 %2214 }
  0xf9   : > { %v2217_v58 = vpop.permute.xlu1 %2216  ;;  %6373 = vmatmul.mubr.msk.bf16.vlgmr.msra.gmra.mrb[4].mxu0 %vm192_vm2, %v7561_v53 }
  0xfa   : > { %v2229_v0 = vsel %vm2228_vm9, %v2215_v57, %v2217_v58  ;;  %3254 = vrot.lane.b32.xlu0 %v7081_v12, %s7030_s3  ;;  %6322 = vmatmul.mubr.msk.bf16.vlgmr.msra.gmra.mrb[4].mxu1 %vm192_vm2, %v6318_v31  ;;  %v6325_v57 = vld [vmem:[%s8829_s1 + $0x14] sm:$0xf] }
  0xfb   : > { %955 = vmatpush1.bf16.msra.mxu1 %v867_v6  ;;  %3256 = vrot.lane.b32.xlu1 %v7076_v11, %s7030_s3  ;;  %v2239_v50 = vsel %vm196_vm1, %v2229_v0, 0 }
  0xfc   : > { %6326 = vmatprep.subr.msk.bf16.mxu1 %vm196_vm1, %v7638_v24  ;;  %v7642_v2 = vpop.permute.xlu0 %2218  ;;  %986 = vmatprep.mubr.bf16.mxu1 %v8832_v5 }
  0xfd   : > { %v7646_v4 = vpop.permute.xlu1 %1182  ;;  %v2230_v18 = vsel %vm2228_vm9, %v2217_v58, %v7642_v2  ;;  %2288 = vmatprep.mubr.bf16.mxu0 %v8832_v5 }
  0xfe   : > { %2220 = vrot.lane.b32.xlu0 %v7088_v14, %s7022_s26  ;;  %6375 = vmatprep.subr.msk.bf16.mxu0 %vm196_vm1, %v2230_v18  ;;  %v7729_v18 = vsel %vm1017_vm10, %v7516_v61, %v7550_v21  ;;  %v1192_v21 = vsel %vm1190_vm12, %v7610_v47, %v7613_v46 }
  0xff   : > { %3260 = vrot.lane.b32.xlu1 %v7083_v13, %s7030_s3  ;;  %2257 = vmatpush1.bf16.msra.mxu0 %v2239_v50  ;;  %8840 = vst [vmem:[#allocation5_spill] sm:$0xff] %v7729_v18 }
 0x100   : > { %v7659_v20 = vpop.permute.xlu0 %1184 }
 0x101   : > { %v7661_v26 = vpop.permute.xlu1 %2222 }
 0x102   : > { %3262 = vrot.lane.b32.xlu0 %v7094_v16, %s7030_s3  ;;  %6324 = vmatmul.mubr.msk.bf16.vlgmr.msra.gmra.mrb[8].mxu1 %vm192_vm2, %v6318_v31 }
 0x103   : > { %1046 = vmatpush1.bf16.msra.mxu1 %v1028_v29  ;;  %3264 = vrot.lane.b32.xlu1 %v7096_v17, %s7030_s3 }
 0x104   : > { %6328 = vmatprep.subr.msk.bf16.mxu1 %vm196_vm1, %v7677_v33  ;;  %v2225_v38 = vpop.permute.xlu0 %2224  ;;  %1077 = vmatprep.mubr.bf16.mxu1 %v8832_v5 }
 0x105   : > { %v2233_v31 = vsel %vm2228_vm9, %v7661_v26, %v2225_v38  ;;  %v2227_v35 = vpop.permute.xlu1 %2226  ;;  %6376 = vmatmul.mubr.msk.bf16.vlgmr.msra.gmra.mrb[0].mxu0 %vm192_vm2, %v7670_v34 }
 0x106   : > { %v2234_v43 = vsel %vm2228_vm9, %v2225_v38, %v2227_v35  ;;  %3425 = vrot.lane.b32.xlu0 %v7074_v10, %s7031_s4  ;;  %v2251_v56 = vsel %vm196_vm1, %v2233_v31, 0  ;;  %2370 = vmatprep.mubr.bf16.mxu0 %v8832_v5  ;;  %v1040_v31 = vsel %vm196_vm1, %v7729_v18, 0  ;;  %v8841_v18 = vmov 0  }
 0x107   : > { %3427 = vrot.lane.b32.xlu1 %v7081_v12, %s7031_s4  ;;  %6379 = vmatprep.subr.msk.bf16.mxu0 %vm196_vm1, %v2234_v43 }
 0x108   : > { %v7702_v58 = vpop.permute.xlu0 %1186  ;;  %2339 = vmatpush1.bf16.msra.mxu0 %v2251_v56 }
 0x109   : > { %v7704_v0 = vpop.permute.xlu1 %1188 }
 0x10a   : > { %3429 = vrot.lane.b32.xlu0 %v7076_v11, %s7031_s4  ;;  %6327 = vmatmul.mubr.msk.bf16.vlgmr.msra.gmra.mrb[0].mxu1 %vm192_vm2, %v6325_v57 }
 0x10b   : > { %1087 = vmatpush1.bf16.msra.mxu1 %v1034_v39  ;;  %2393 = vrot.lane.b32.xlu1 %v7088_v14, %s7023_s29  ;;  %s7032_s29 = smov 48   ;;  %v7763_v39 = vld [vmem:[%s8829_s1 + $0x34] sm:$0xf] }
 0x10c   : > { %6330 = vmatprep.subr.msk.bf16.mxu1 %vm196_vm1, %v7716_v59  ;;  %v2388_v6 = vpop.permute.xlu0 %2387  ;;  %1118 = vmatprep.mubr.bf16.mxu1 %v8832_v5 }
 0x10d   : > { %v2390_v50 = vpop.permute.xlu1 %2389  ;;  %6380 = vmatmul.mubr.msk.bf16.vlgmr.msra.gmra.mrb[4].mxu0 %vm192_vm2, %v7670_v34 }
 0x10e   : > { %3433 = vrot.lane.b32.xlu0 %v7083_v13, %s7031_s4  ;;  %2461 = vmatprep.mubr.bf16.mxu0 %v8832_v5  ;;  %v2402_v19 = vsel %vm2401_vm11, %v2388_v6, %v2390_v50  ;;  %v1191_v6 = vsel %vm1190_vm12, %v7592_v37, %v7610_v47  ;;  %v1194_v37 = vsel %vm1190_vm12, %v7646_v4, %v7659_v20 }
 0x10f   : > { %3435 = vrot.lane.b32.xlu1 %v7094_v16, %s7031_s4  ;;  %v2412_v35 = vsel %vm196_vm1, %v2402_v19, 0 }
 0x110   : > { %v7734_v29 = vpop.permute.xlu0 %2391 }
 0x111   : > { %v7736_v38 = vpop.permute.xlu1 %1349  ;;  %v2403_v61 = vsel %vm2401_vm11, %v2390_v50, %v7734_v29 }
 0x112   : > { %3437 = vrot.lane.b32.xlu0 %v7096_v17, %s7031_s4  ;;  %6329 = vmatmul.mubr.msk.bf16.vlgmr.msra.gmra.mrb[4].mxu1 %vm192_vm2, %v6325_v57 }
 0x113   : > { %1128 = vmatpush1.bf16.msra.mxu1 %v1040_v31  ;;  %2566 = vrot.lane.b32.xlu1 %v7088_v14, %s7025_s5 }
 0x114   : > { %6333 = vmatprep.subr.msk.bf16.mxu1 %vm196_vm1, %v1192_v21  ;;  %v7752_v43 = vpop.permute.xlu0 %1351  ;;  %1159 = vmatprep.mubr.bf16.mxu1 %v8832_v5 }
 0x115   : > { %v7755_v56 = vpop.permute.xlu1 %1353  ;;  %6382 = vmatprep.subr.msk.bf16.mxu0 %vm196_vm1, %v2403_v61  ;;  %v1201_v61 = vsel %vm196_vm1, %v1191_v6, 0  ;;  %v1193_v6 = vsel %vm1190_vm12, %v7613_v46, %v7646_v4  ;;  %v1196_v46 = vsel %vm1190_vm12, %v7702_v58, %v7704_v0 }
 0x116   : > { %3598 = vrot.lane.b32.xlu0 %v7074_v10, %s7032_s29  ;;  %2430 = vmatpush1.bf16.msra.mxu0 %v2412_v35 }
 0x117   : > { %3600 = vrot.lane.b32.xlu1 %v7081_v12, %s7032_s29 }
 0x118   : > { %v7770_v50 = vpop.permute.xlu0 %2395 }
 0x119   : > { %v2398_v19 = vpop.permute.xlu1 %2397  ;;  %6383 = vmatmul.mubr.msk.bf16.vlgmr.msra.gmra.mrb[0].mxu0 %vm192_vm2, %v7763_v39 }
 0x11a   : > { %v2406_v31 = vsel %vm2401_vm11, %v7770_v50, %v2398_v19  ;;  %3602 = vrot.lane.b32.xlu0 %v7076_v11, %s7032_s29  ;;  %6331 = vmatmul.mubr.msk.bf16.vlgmr.msra.gmra.mrb[8].mxu1 %vm192_vm2, %v6325_v57 }
 0x11b   : > { %1219 = vmatpush1.bf16.msra.mxu1 %v1201_v61  ;;  %3606 = vrot.lane.b32.xlu1 %v7083_v13, %s7032_s29  ;;  %v2424_v21 = vsel %vm196_vm1, %v2406_v31, 0 }
 0x11c   : > { %6335 = vmatprep.subr.msk.bf16.mxu1 %vm196_vm1, %v1194_v37  ;;  %v2400_v47 = vpop.permute.xlu0 %2399  ;;  %1250 = vmatprep.mubr.bf16.mxu1 %v8832_v5  ;;  %v1207_v37 = vsel %vm196_vm1, %v1193_v6, 0  ;;  %v1195_v6 = vsel %vm1190_vm12, %v7659_v20, %v7702_v58  ;;  %v7842_v20 = vld [vmem:[%s8829_s1 + $0x38] sm:$0xf]  ;;  %v1365_v58 = vsel %vm1363_vm14, %v7752_v43, %v7755_v56  ;;  %vm2920_vm12 = vcmask 588800  }
 0x11d   : > { %v2407_v35 = vsel %vm2401_vm11, %v2398_v19, %v2400_v47  ;;  %v7789_v57 = vpop.permute.xlu1 %1355  ;;  %2543 = vmatprep.mubr.bf16.mxu0 %v8832_v5  ;;  %v6332_v19 = vld [vmem:[%s8829_s1 + $0x18] sm:$0xf] }
 0x11e   : > { %3608 = vrot.lane.b32.xlu0 %v7094_v16, %s7032_s29  ;;  %6386 = vmatprep.subr.msk.bf16.mxu0 %vm196_vm1, %v2407_v35 }
 0x11f   : > { %3610 = vrot.lane.b32.xlu1 %v7096_v17, %s7032_s29  ;;  %2512 = vmatpush1.bf16.msra.mxu0 %v2424_v21 }
 0x120   : > { %v7803_v31 = vpop.permute.xlu0 %1357 }
 0x121   : > { %v2561_v61 = vpop.permute.xlu1 %2560 }
 0x122   : > { %2739 = vrot.lane.b32.xlu0 %v7088_v14, %s7027_s13  ;;  %6334 = vmatmul.mubr.msk.bf16.vlgmr.msra.gmra.mrb[0].mxu1 %vm192_vm2, %v6332_v19  ;;  %s7040_s13 = smov 20  }
 0x123   : > { %1260 = vmatpush1.bf16.msra.mxu1 %v1207_v37  ;;  %3771 = vrot.lane.b32.xlu1 %v7074_v10, %s7033_s14 }
 0x124   : > { %6337 = vmatprep.subr.msk.bf16.mxu1 %vm196_vm1, %v1196_v46  ;;  %v2563_v4 = vpop.permute.xlu0 %2562  ;;  %1291 = vmatprep.mubr.bf16.mxu1 %v8832_v5  ;;  %v1213_v46 = vsel %vm196_vm1, %v1195_v6, 0 }
 0x125   : > { %v2575_v47 = vsel %vm2574_vm13, %v2561_v61, %v2563_v4  ;;  %v7817_v21 = vpop.permute.xlu1 %2564  ;;  %6387 = vmatmul.mubr.msk.bf16.vlgmr.msra.gmra.mrb[4].mxu0 %vm192_vm2, %v7763_v39 }
 0x126   : > { %3773 = vrot.lane.b32.xlu0 %v7081_v12, %s7033_s14  ;;  %v2576_v0 = vsel %vm2574_vm13, %v2563_v4, %v7817_v21  ;;  %v2585_v35 = vsel %vm196_vm1, %v2575_v47, 0  ;;  %2634 = vmatprep.mubr.bf16.mxu0 %v8832_v5 }
 0x127   : > { %3775 = vrot.lane.b32.xlu1 %v7076_v11, %s7033_s14  ;;  %6389 = vmatprep.subr.msk.bf16.mxu0 %vm196_vm1, %v2576_v0  ;;  %v1364_v0 = vsel %vm1363_vm14, %v7736_v38, %v7752_v43 }
 0x128   : > { %v7833_v61 = vpop.permute.xlu0 %1359  ;;  %2603 = vmatpush1.bf16.msra.mxu0 %v2585_v35  ;;  %v1374_v38 = vsel %vm196_vm1, %v1364_v0, 0  ;;  %v6339_v0 = vld [vmem:[%s8829_s1 + $0x1c] sm:$0xf] }
 0x129   : > { %v1362_v37 = vpop.permute.xlu1 %1361 }
 0x12a   : > { %2912 = vrot.lane.b32.xlu0 %v7088_v14, %s7028_s25  ;;  %6336 = vmatmul.mubr.msk.bf16.vlgmr.msra.gmra.mrb[4].mxu1 %vm192_vm2, %v6332_v19 }
 0x12b   : > { %1301 = vmatpush1.bf16.msra.mxu1 %v1213_v46  ;;  %3779 = vrot.lane.b32.xlu1 %v7083_v13, %s7033_s14 }
 0x12c   : > { %6340 = vmatprep.subr.msk.bf16.mxu1 %vm196_vm1, %v1365_v58  ;;  %v7850_v4 = vpop.permute.xlu0 %2568  ;;  %1332 = vmatprep.mubr.bf16.mxu1 %v8832_v5  ;;  %v1367_v58 = vsel %vm1363_vm14, %v7789_v57, %v7803_v31 }
 0x12d   : > { %v2571_v47 = vpop.permute.xlu1 %2570  ;;  %6390 = vmatmul.mubr.msk.bf16.vlgmr.msra.gmra.mrb[0].mxu0 %vm192_vm2, %v7842_v20 }
 0x12e   : > { %3781 = vrot.lane.b32.xlu0 %v7094_v16, %s7033_s14  ;;  %2716 = vmatprep.mubr.bf16.mxu0 %v8832_v5  ;;  %v2579_v35 = vsel %vm2574_vm13, %v7850_v4, %v2571_v47 }
 0x12f   : > { %3783 = vrot.lane.b32.xlu1 %v7096_v17, %s7033_s14  ;;  %v2597_v43 = vsel %vm196_vm1, %v2579_v35, 0 }
 0x130   : > { %v2573_v6 = vpop.permute.xlu0 %2572 }
 0x131   : > { %v7865_v46 = vpop.permute.xlu1 %1522  ;;  %v2580_v33 = vsel %vm2574_vm13, %v2571_v47, %v2573_v6 }
 0x132   : > { %3944 = vrot.lane.b32.xlu0 %v7074_v10, %s7034_s16  ;;  %6338 = vmatmul.mubr.msk.bf16.vlgmr.msra.gmra.mrb[8].mxu1 %vm192_vm2, %v6332_v19  ;;  %v1366_v19 = vsel %vm1363_vm14, %v7755_v56, %v7789_v57 }
 0x133   : > { %1392 = vmatpush1.bf16.msra.mxu1 %v1374_v38  ;;  %3946 = vrot.lane.b32.xlu1 %v7081_v12, %s7034_s16  ;;  %v1380_v56 = vsel %vm196_vm1, %v1366_v19, 0  ;;  %v1368_v19 = vsel %vm1363_vm14, %v7803_v31, %v7833_v61 }
 0x134   : > { %6342 = vmatprep.subr.msk.bf16.mxu1 %vm196_vm1, %v1367_v58  ;;  %v1525_v5 = vpop.permute.xlu0 %1524  ;;  %1423 = vmatprep.mubr.bf16.mxu1 %v8841_v18  ;;  %v1386_v31 = vsel %vm196_vm1, %v1368_v19, 0 }
 0x135   : > { %v7880_v47 = vpop.permute.xlu1 %1526  ;;  %6393 = vmatprep.subr.msk.bf16.mxu0 %vm196_vm1, %v2580_v33  ;;  %v1369_v33 = vsel %vm1363_vm14, %v7833_v61, %v1362_v37  ;;  %vm3093_vm14 = vcmask 580608  }
 0x136   : > { %3948 = vrot.lane.b32.xlu0 %v7076_v11, %s7034_s16  ;;  %2685 = vmatpush1.bf16.msra.mxu0 %v2597_v43 }
 0x137   : > { %3085 = vrot.lane.b32.xlu1 %v7088_v14, %s7029_s21 }
 0x138   : > { %v2734_v35 = vpop.permute.xlu0 %2733 }
 0x139   : > { %v2736_v6 = vpop.permute.xlu1 %2735  ;;  %6394 = vmatmul.mubr.msk.bf16.vlgmr.msra.gmra.mrb[4].mxu0 %vm192_vm2, %v7842_v20 }
 0x13a   : > { %v2748_v58 = vsel %vm2747_vm15, %v2734_v35, %v2736_v6  ;;  %3952 = vrot.lane.b32.xlu0 %v7083_v13, %s7034_s16  ;;  %6341 = vmatmul.mubr.msk.bf16.vlgmr.msra.gmra.mrb[0].mxu1 %vm192_vm2, %v6339_v0 }
 0x13b   : > { %1433 = vmatpush1.bf16.msra.mxu1 %v1380_v56  ;;  %3954 = vrot.lane.b32.xlu1 %v7094_v16, %s7034_s16  ;;  %v2758_v37 = vsel %vm196_vm1, %v2748_v58, 0  ;;  %v7929_v58 = vld [vmem:[%s8829_s1 + $0x3c] sm:$0xf] }
 0x13c   : > { %6344 = vmatprep.subr.msk.bf16.mxu1 %vm196_vm1, %v1369_v33  ;;  %v7905_v57 = vpop.permute.xlu0 %2737  ;;  %1464 = vmatprep.mubr.bf16.mxu1 %v8841_v18 }
 0x13d   : > { %v1529_v38 = vpop.permute.xlu1 %1528  ;;  %v2749_v43 = vsel %vm2747_vm15, %v2736_v6, %v7905_v57  ;;  %2807 = vmatprep.mubr.bf16.mxu0 %v8841_v18  ;;  %v1538_v6 = vsel %vm1536_vm0, %v1525_v5, %v7880_v47 }
 0x13e   : > { %3956 = vrot.lane.b32.xlu0 %v7096_v17, %s7034_s16  ;;  %6396 = vmatprep.subr.msk.bf16.mxu0 %vm196_vm1, %v2749_v43 }
 0x13f   : > { %3258 = vrot.lane.b32.xlu1 %v7088_v14, %s7030_s3  ;;  %2776 = vmatpush1.bf16.msra.mxu0 %v2758_v37 }
 0x140   : > { %v7920_v35 = vpop.permute.xlu0 %1530 }
 0x141   : > { %v7922_v33 = vpop.permute.xlu1 %2741  ;;  %v1540_v52 = vsel %vm1536_vm0, %v1529_v38, %v7920_v35 }
 0x142   : > { %4117 = vrot.lane.b32.xlu0 %v7074_v10, %s7035_s28  ;;  %6343 = vmatmul.mubr.msk.bf16.vlgmr.msra.gmra.mrb[4].mxu1 %vm192_vm2, %v6339_v0 }
 0x143   : > { %1474 = vmatpush1.bf16.msra.mxu1 %v1386_v31  ;;  %4119 = vrot.lane.b32.xlu1 %v7081_v12, %s7035_s28 }
 0x144   : > { %6347 = vmatprep.subr.msk.bf16.mxu1 %vm196_vm1, %v1538_v6  ;;  %v2744_v61 = vpop.permute.xlu0 %2743  ;;  %6397 = vmatmul.mubr.msk.bf16.vlgmr.msra.gmra.mrb[0].mxu0 %vm192_vm2, %v7929_v58  ;;  %v1537_v6 = vsel %vm1536_vm0, %v7865_v46, %v1525_v5 }
 0x145   : > { %v2752_v56 = vsel %vm2747_vm15, %v7922_v33, %v2744_v61  ;;  %v2746_v37 = vpop.permute.xlu1 %2745  ;;  %1505 = vmatprep.mubr.bf16.mxu1 %v8841_v18  ;;  %2889 = vmatprep.mubr.bf16.mxu0 %v8841_v18 }
 0x146   : > { %v2753_v43 = vsel %vm2747_vm15, %v2744_v61, %v2746_v37  ;;  %4121 = vrot.lane.b32.xlu0 %v7076_v11, %s7035_s28  ;;  %v2770_v19 = vsel %vm196_vm1, %v2752_v56, 0  ;;  %v1547_v61 = vsel %vm196_vm1, %v1537_v6, 0  ;;  %v1539_v56 = vsel %vm1536_vm0, %v7880_v47, %v1529_v38 }
 0x147   : > { %4125 = vrot.lane.b32.xlu1 %v7083_v13, %s7035_s28  ;;  %6400 = vmatprep.subr.msk.bf16.mxu0 %vm196_vm1, %v2753_v43  ;;  %v1553_v47 = vsel %vm196_vm1, %v1539_v56, 0 }
 0x148   : > { %v1533_v31 = vpop.permute.xlu0 %1532  ;;  %2858 = vmatpush1.bf16.msra.mxu0 %v2770_v19 }
 0x149   : > { %v1535_v55 = vpop.permute.xlu1 %1534 }
 0x14a   : > { %4127 = vrot.lane.b32.xlu0 %v7094_v16, %s7035_s28  ;;  %6345 = vmatmul.mubr.msk.bf16.vlgmr.msra.gmra.mrb[8].mxu1 %vm192_vm2, %v6339_v0 }
 0x14b   : > { %1565 = vmatpush1.bf16.msra.mxu1 %v1547_v61  ;;  %4129 = vrot.lane.b32.xlu1 %v7096_v17, %s7035_s28  ;;  %v1542_v61 = vsel %vm1536_vm0, %v1533_v31, %v1535_v55  ;;  %v7994_v55 = vld [vmem:[%s8829_s1 + $0x40] sm:$0xf] }
 0x14c   : > { %v2907_v5 = vpop.permute.xlu0 %2906  ;;  %6349 = vmatprep.subr.msk.bf16.mxu1 %vm196_vm1, %v1540_v52  ;;  %6401 = vmatmul.mubr.msk.bf16.vlgmr.msra.gmra.mrb[4].mxu0 %vm192_vm2, %v7929_v58  ;;  %v6346_v52 = vld [vmem:[%s8829_s1 + $0x20] sm:$0xf] }
 0x14d   : > { %v2909_v46 = vpop.permute.xlu1 %2908  ;;  %1596 = vmatprep.mubr.bf16.mxu1 %v8841_v18  ;;  %2980 = vmatprep.mubr.bf16.mxu0 %v8841_v18 }
 0x14e   : > { %v2921_v0 = vsel %vm2920_vm12, %v2907_v5, %v2909_v46  ;;  %3431 = vrot.lane.b32.xlu0 %v7088_v14, %s7031_s4  ;;  %s7037_s4 = smov 23  }
 0x14f   : > { %4290 = vrot.lane.b32.xlu1 %v7074_v10, %s7036_s22  ;;  %v2931_v6 = vsel %vm196_vm1, %v2921_v0, 0 }
 0x150   : > { %v7976_v37 = vpop.permute.xlu0 %2910 }
 0x151   : > { %v1702_v43 = vpop.permute.xlu1 %1701  ;;  %v2922_v19 = vsel %vm2920_vm12, %v2909_v46, %v7976_v37  ;;  %v1541_v46 = vsel %vm1536_vm0, %v7920_v35, %v1533_v31  ;;  %vm4477_vm0 = vcmask 187392  }
 0x152   : > { %4292 = vrot.lane.b32.xlu0 %v7081_v12, %s7036_s22  ;;  %6348 = vmatmul.mubr.msk.bf16.vlgmr.msra.gmra.mrb[0].mxu1 %vm192_vm2, %v6346_v52  ;;  %v1559_v35 = vsel %vm196_vm1, %v1541_v46, 0  ;;  %v1712_v46 = vsel %vm1709_vm4, %v7345_v63, %v1702_v43 }
 0x153   : > { %1606 = vmatpush1.bf16.msra.mxu1 %v1553_v47  ;;  %6403 = vmatprep.subr.msk.bf16.mxu0 %vm196_vm1, %v2922_v19  ;;  %v1726_v63 = vsel %vm196_vm1, %v1712_v46, 0 }
 0x154   : > { %4294 = vrot.lane.b32.xlu1 %v7076_v11, %s7036_s22  ;;  %2949 = vmatpush1.bf16.msra.mxu0 %v2931_v6  ;;  %v7989_v38 = vpop.permute.xlu0 %2914 }
 0x155   : > { %v2917_v5 = vpop.permute.xlu1 %2916  ;;  %6351 = vmatprep.subr.msk.bf16.mxu1 %vm196_vm1, %v1542_v61  ;;  %1637 = vmatprep.mubr.bf16.mxu1 %v8841_v18  ;;  %v1713_v61 = vsel %vm1709_vm4, %v1702_v43, %v7368_v7  ;;  %vm3266_vm4 = vcmask 408576  }
 0x156   : > { %3604 = vrot.lane.b32.xlu0 %v7088_v14, %s7032_s29  ;;  %v2925_v0 = vsel %vm2920_vm12, %v7989_v38, %v2917_v5  ;;  %s7038_s29 = smov 22  }
 0x157   : > { %6404 = vmatmul.mubr.msk.bf16.vlgmr.msra.gmra.mrb[0].mxu0 %vm192_vm2, %v7994_v55  ;;  %v2943_v31 = vsel %vm196_vm1, %v2925_v0, 0 }
 0x158   : > { %4298 = vrot.lane.b32.xlu1 %v7083_v13, %s7036_s22  ;;  %v2919_v56 = vpop.permute.xlu0 %2918  ;;  %3062 = vmatprep.mubr.bf16.mxu0 %v8841_v18 }
 0x159   : > { %v2926_v19 = vsel %vm2920_vm12, %v2917_v5, %v2919_v56  ;;  %v1875_v6 = vpop.permute.xlu1 %1874 }
 0x15a   : > { %4300 = vrot.lane.b32.xlu0 %v7094_v16, %s7036_s22  ;;  %6350 = vmatmul.mubr.msk.bf16.vlgmr.msra.gmra.mrb[4].mxu1 %vm192_vm2, %v6346_v52  ;;  %v1885_v46 = vsel %vm1882_vm6, %v7437_v32, %v1875_v6 }
 0x15b   : > { %1647 = vmatpush1.bf16.msra.mxu1 %v1559_v35  ;;  %6407 = vmatprep.subr.msk.bf16.mxu0 %vm196_vm1, %v2926_v19  ;;  %v1886_v35 = vsel %vm1882_vm6, %v1875_v6, %v7480_v44  ;;  %v1899_v32 = vsel %vm196_vm1, %v1885_v46, 0  ;;  %vm3439_vm6 = vcmask 400384  }
 0x15c   : > { %4302 = vrot.lane.b32.xlu1 %v7096_v17, %s7036_s22  ;;  %6356 = vmatprep.subr.msk.bf16.mxu1 %vm196_vm1, %v1713_v61  ;;  %v3080_v47 = vpop.permute.xlu0 %3079 }
 0x15d   : > { %3031 = vmatpush1.bf16.msra.mxu0 %v2943_v31  ;;  %v3082_v5 = vpop.permute.xlu1 %3081  ;;  %1678 = vmatprep.mubr.bf16.mxu1 %v8841_v18 }
 0x15e   : > { %4463 = vrot.lane.b32.xlu0 %v7074_v10, %s7037_s4  ;;  %v3094_v7 = vsel %vm3093_vm14, %v3080_v47, %v3082_v5  ;;  %v8054_v47 = vld [vmem:[%s8829_s1 + $0x44] sm:$0xf] }
 0x15f   : > { %v3104_v43 = vsel %vm196_vm1, %v3094_v7, 0 }
 0x160   : > { %6408 = vmatmul.mubr.msk.bf16.vlgmr.msra.gmra.mrb[4].mxu0 %vm192_vm2, %v7994_v55  ;;  %4465 = vrot.lane.b32.xlu1 %v7081_v12, %s7037_s4  ;;  %v8031_v0 = vpop.permute.xlu0 %3083 }
 0x161   : > { %v8033_v56 = vpop.permute.xlu1 %3087  ;;  %v3095_v19 = vsel %vm3093_vm14, %v3082_v5, %v8031_v0  ;;  %3153 = vmatprep.mubr.bf16.mxu0 %v8841_v18 }
 0x162   : > { %4467 = vrot.lane.b32.xlu0 %v7076_v11, %s7037_s4  ;;  %6352 = vmatmul.mubr.msk.bf16.vlgmr.msra.gmra.mrb[8].mxu1 %vm192_vm2, %v6346_v52 }
 0x163   : > { %1779 = vmatpush1.bf16.msra.mxu1 %v1726_v63  ;;  %6410 = vmatprep.subr.msk.bf16.mxu0 %vm196_vm1, %v3095_v19 }
 0x164   : > { %3777 = vrot.lane.b32.xlu1 %v7088_v14, %s7033_s14  ;;  %6363 = vmatprep.subr.msk.bf16.mxu1 %vm196_vm1, %v1886_v35  ;;  %v3090_v31 = vpop.permute.xlu0 %3089 }
 0x165   : > { %3122 = vmatpush1.bf16.msra.mxu0 %v3104_v43  ;;  %v3098_v52 = vsel %vm3093_vm14, %v8033_v56, %v3090_v31  ;;  %v3092_v61 = vpop.permute.xlu1 %3091  ;;  %1810 = vmatprep.mubr.bf16.mxu1 %v8841_v18 }
 0x166   : > { %v3099_v44 = vsel %vm3093_vm14, %v3090_v31, %v3092_v61  ;;  %4471 = vrot.lane.b32.xlu0 %v7083_v13, %s7037_s4  ;;  %v3116_v5 = vsel %vm196_vm1, %v3098_v52, 0 }
 0x167   : > { %6414 = vmatprep.subr.msk.bf16.mxu0 %vm196_vm1, %v3099_v44 }
 0x168   : > { %6411 = vmatmul.mubr.msk.bf16.vlgmr.msra.gmra.mrb[0].mxu0 %vm192_vm2, %v8054_v47  ;;  %4473 = vrot.lane.b32.xlu1 %v7094_v16, %s7037_s4  ;;  %v2048_v7 = vpop.permute.xlu0 %2047 }
 0x169   : > { %v3253_v19 = vpop.permute.xlu1 %3252  ;;  %v2059_v63 = vsel %vm2055_vm8, %v2048_v7, %v7572_v28  ;;  %3204 = vmatpush1.bf16.msra.mxu0 %v3116_v5  ;;  %3235 = vmatprep.mubr.bf16.mxu0 %v8841_v18  ;;  %v2058_v61 = vsel %vm2055_vm8, %v7534_v8, %v2048_v7  ;;  %vm3612_vm8 = vcmask 392192  }
 0x16a   : > { %4475 = vrot.lane.b32.xlu0 %v7096_v17, %s7037_s4  ;;  %6357 = vmatmul.mubr.msk.bf16.vlgmr.msra.gmra.mrb[4].mxu1 %vm192_vm2, %v7378_v9  ;;  %v2072_v8 = vsel %vm196_vm1, %v2058_v61, 0 }
 0x16b   : > { %1952 = vmatpush1.bf16.msra.mxu1 %v1899_v32  ;;  %1983 = vmatprep.mubr.bf16.mxu1 %v8841_v18 }
 0x16c   : > { %3950 = vrot.lane.b32.xlu1 %v7088_v14, %s7034_s16  ;;  %6370 = vmatprep.subr.msk.bf16.mxu1 %vm196_vm1, %v2059_v63  ;;  %v3255_v28 = vpop.permute.xlu0 %3254 }
 0x16d   : > { %v3267_v6 = vsel %vm3266_vm4, %v3253_v19, %v3255_v28  ;;  %v8081_v43 = vpop.permute.xlu1 %3256  ;;  %v8107_v19 = vld [vmem:[%s8829_s1 + $0x48] sm:$0xf] }
 0x16e   : > { %4636 = vrot.lane.b32.xlu0 %v7074_v10, %s7038_s29  ;;  %v3268_v9 = vsel %vm3266_vm4, %v3255_v28, %v8081_v43  ;;  %v3277_v35 = vsel %vm196_vm1, %v3267_v6, 0 }
 0x16f   : > { %6417 = vmatprep.subr.msk.bf16.mxu0 %vm196_vm1, %v3268_v9 }
 0x170   : > { %6415 = vmatmul.mubr.msk.bf16.vlgmr.msra.gmra.mrb[4].mxu0 %vm192_vm2, %v8054_v47  ;;  %4638 = vrot.lane.b32.xlu1 %v7081_v12, %s7038_s29  ;;  %v2221_v31 = vpop.permute.xlu0 %2220 }
 0x171   : > { %v8093_v52 = vpop.permute.xlu1 %3260  ;;  %3295 = vmatpush1.bf16.msra.mxu0 %v3277_v35  ;;  %3326 = vmatprep.mubr.bf16.mxu0 %v8841_v18  ;;  %v2232_v32 = vsel %vm2228_vm9, %v2221_v31, %v7661_v26 }
 0x172   : > { %4640 = vrot.lane.b32.xlu0 %v7076_v11, %s7038_s29 }
 0x174   : > { %4644 = vrot.lane.b32.xlu1 %v7083_v13, %s7038_s29  ;;  %v3263_v44 = vpop.permute.xlu0 %3262 }
 0x175   : > { %v3271_v5 = vsel %vm3266_vm4, %v8093_v52, %v3263_v44  ;;  %v3265_v46 = vpop.permute.xlu1 %3264 }
 0x176   : > { %v3272_v63 = vsel %vm3266_vm4, %v3263_v44, %v3265_v46  ;;  %4646 = vrot.lane.b32.xlu0 %v7094_v16, %s7038_s29  ;;  %6364 = vmatmul.mubr.msk.bf16.vlgmr.msra.gmra.mrb[4].mxu1 %vm192_vm2, %v7468_v40  ;;  %v3289_v7 = vsel %vm196_vm1, %v3271_v5, 0  ;;  %v2231_v44 = vsel %vm2228_vm9, %v7642_v2, %v2221_v31  ;;  %vm3785_vm9 = vcmask 384000  }
 0x177   : > { %2125 = vmatpush1.bf16.msra.mxu1 %v2072_v8  ;;  %6421 = vmatprep.subr.msk.bf16.mxu0 %vm196_vm1, %v3272_v63  ;;  %v2245_v2 = vsel %vm196_vm1, %v2231_v44, 0 }
 0x178   : > { %6418 = vmatmul.mubr.msk.bf16.vlgmr.msra.gmra.mrb[0].mxu0 %vm192_vm2, %v8107_v19  ;;  %4648 = vrot.lane.b32.xlu1 %v7096_v17, %s7038_s29  ;;  %v3426_v28 = vpop.permute.xlu0 %3425 }
 0x179   : > { %6377 = vmatprep.subr.msk.bf16.mxu1 %vm196_vm1, %v2232_v32  ;;  %v3428_v40 = vpop.permute.xlu1 %3427  ;;  %3377 = vmatpush1.bf16.msra.mxu0 %v3289_v7  ;;  %v8165_v32 = vld [vmem:[%s8829_s1 + $0x4c] sm:$0xf] }
 0x17a   : > { %4123 = vrot.lane.b32.xlu0 %v7088_v14, %s7035_s28  ;;  %3408 = vmatprep.mubr.bf16.mxu0 %v8841_v18  ;;  %v3440_v6 = vsel %vm3439_vm6, %v3426_v28, %v3428_v40  ;;  %s7043_s28 = smov 121  }
 0x17b   : > { %2156 = vmatprep.mubr.bf16.mxu1 %v8841_v18  ;;  %v3450_v61 = vsel %vm196_vm1, %v3440_v6, 0 }
 0x17c   : > { %4809 = vrot.lane.b32.xlu1 %v7074_v10, %s7039_s11  ;;  %v8131_v26 = vpop.permute.xlu0 %3429 }
 0x17d   : > { %v2394_v9 = vpop.permute.xlu1 %2393  ;;  %v3441_v35 = vsel %vm3439_vm6, %v3428_v40, %v8131_v26 }
 0x17e   : > { %4811 = vrot.lane.b32.xlu0 %v7081_v12, %s7039_s11  ;;  %6424 = vmatprep.subr.msk.bf16.mxu0 %vm196_vm1, %v3441_v35  ;;  %v2405_v31 = vsel %vm2401_vm11, %v2394_v9, %v7770_v50  ;;  %v2404_v6 = vsel %vm2401_vm11, %v7734_v29, %v2394_v9  ;;  %vm3958_vm11 = vcmask 375808  }
 0x180   : > { %6422 = vmatmul.mubr.msk.bf16.vlgmr.msra.gmra.mrb[4].mxu0 %vm192_vm2, %v8107_v19  ;;  %4813 = vrot.lane.b32.xlu1 %v7076_v11, %s7039_s11  ;;  %v8145_v5 = vpop.permute.xlu0 %3433 }
 0x181   : > { %v3436_v46 = vpop.permute.xlu1 %3435  ;;  %3468 = vmatpush1.bf16.msra.mxu0 %v3450_v61  ;;  %3499 = vmatprep.mubr.bf16.mxu0 %v8841_v18 }
 0x182   : > { %4296 = vrot.lane.b32.xlu0 %v7088_v14, %s7036_s22  ;;  %6371 = vmatmul.mubr.msk.bf16.vlgmr.msra.gmra.mrb[4].mxu1 %vm192_vm2, %v7561_v53  ;;  %v3444_v63 = vsel %vm3439_vm6, %v8145_v5, %v3436_v46 }
 0x183   : > { %2298 = vmatpush1.bf16.msra.mxu1 %v2245_v2  ;;  %2329 = vmatprep.mubr.bf16.mxu1 %v8841_v18  ;;  %v3462_v50 = vsel %vm196_vm1, %v3444_v63, 0  ;;  %v2418_v2 = vsel %vm196_vm1, %v2404_v6, 0 }
 0x184   : > { %4817 = vrot.lane.b32.xlu1 %v7083_v13, %s7039_s11  ;;  %6384 = vmatprep.subr.msk.bf16.mxu1 %vm196_vm1, %v2405_v31  ;;  %v3438_v8 = vpop.permute.xlu0 %3437 }
 0x185   : > { %v3445_v7 = vsel %vm3439_vm6, %v3436_v46, %v3438_v8  ;;  %v2567_v53 = vpop.permute.xlu1 %2566 }
 0x186   : > { %4819 = vrot.lane.b32.xlu0 %v7094_v16, %s7039_s11  ;;  %6428 = vmatprep.subr.msk.bf16.mxu0 %vm196_vm1, %v3445_v7  ;;  %v2578_v29 = vsel %vm2574_vm13, %v2567_v53, %v7850_v4 }
 0x188   : > { %6425 = vmatmul.mubr.msk.bf16.vlgmr.msra.gmra.mrb[0].mxu0 %vm192_vm2, %v8165_v32  ;;  %4821 = vrot.lane.b32.xlu1 %v7096_v17, %s7039_s11  ;;  %v3599_v28 = vpop.permute.xlu0 %3598 }
 0x189   : > { %v3601_v40 = vpop.permute.xlu1 %3600  ;;  %3550 = vmatpush1.bf16.msra.mxu0 %v3462_v50  ;;  %3581 = vmatprep.mubr.bf16.mxu0 %v8841_v18  ;;  %v8216_v50 = vld [vmem:[%s8829_s1 + $0x50] sm:$0xf] }
 0x18a   : > { %4982 = vrot.lane.b32.xlu0 %v7074_v10, %s7040_s13  ;;  %v3613_v35 = vsel %vm3612_vm8, %v3599_v28, %v3601_v40 }
 0x18b   : > { %v3623_v31 = vsel %vm196_vm1, %v3613_v35, 0 }
 0x18c   : > { %4984 = vrot.lane.b32.xlu1 %v7081_v12, %s7040_s13  ;;  %v8183_v61 = vpop.permute.xlu0 %3602 }
 0x18d   : > { %v3614_v44 = vsel %vm3612_vm8, %v3601_v40, %v8183_v61  ;;  %v8187_v46 = vpop.permute.xlu1 %3606  ;;  %v2577_v40 = vsel %vm2574_vm13, %v7817_v21, %v2567_v53  ;;  %vm4131_vm13 = vcmask 367616  }
 0x18e   : > { %4986 = vrot.lane.b32.xlu0 %v7076_v11, %s7040_s13  ;;  %6378 = vmatmul.mubr.msk.bf16.vlgmr.msra.gmra.mrb[4].mxu1 %vm192_vm2, %v7670_v34 }
 0x18f   : > { %2471 = vmatpush1.bf16.msra.mxu1 %v2418_v2  ;;  %6431 = vmatprep.subr.msk.bf16.mxu0 %vm196_vm1, %v3614_v44  ;;  %v2591_v44 = vsel %vm196_vm1, %v2577_v40, 0 }
 0x190   : > { %6429 = vmatmul.mubr.msk.bf16.vlgmr.msra.gmra.mrb[4].mxu0 %vm192_vm2, %v8165_v32  ;;  %4469 = vrot.lane.b32.xlu1 %v7088_v14, %s7037_s4  ;;  %v3609_v9 = vpop.permute.xlu0 %3608 }
 0x191   : > { %6391 = vmatprep.subr.msk.bf16.mxu1 %vm196_vm1, %v2578_v29  ;;  %v3611_v63 = vpop.permute.xlu1 %3610  ;;  %3641 = vmatpush1.bf16.msra.mxu0 %v3623_v31  ;;  %v3617_v34 = vsel %vm3612_vm8, %v8187_v46, %v3609_v9 }
 0x192   : > { %v3618_v8 = vsel %vm3612_vm8, %v3609_v9, %v3611_v63  ;;  %4990 = vrot.lane.b32.xlu0 %v7083_v13, %s7040_s13  ;;  %3672 = vmatprep.mubr.bf16.mxu0 %v8841_v18  ;;  %v3635_v28 = vsel %vm196_vm1, %v3617_v34, 0 }
 0x193   : > { %2502 = vmatprep.mubr.bf16.mxu1 %v8841_v18  ;;  %6435 = vmatprep.subr.msk.bf16.mxu0 %vm196_vm1, %v3618_v8 }
 0x194   : > { %4992 = vrot.lane.b32.xlu1 %v7094_v16, %s7040_s13  ;;  %v2740_v4 = vpop.permute.xlu0 %2739 }
 0x195   : > { %v3772_v7 = vpop.permute.xlu1 %3771  ;;  %v2751_v21 = vsel %vm2747_vm15, %v2740_v4, %v7922_v33  ;;  %v2750_v63 = vsel %vm2747_vm15, %v7905_v57, %v2740_v4  ;;  %v8278_v57 = vcombine.high %v7096_v17, %v7096_v17  ;;  %vm4304_vm15 = vcmask 195584  }
 0x196   : > { %4994 = vrot.lane.b32.xlu0 %v7096_v17, %s7040_s13  ;;  %v2764_v40 = vsel %vm196_vm1, %v2750_v63, 0 }
 0x198   : > { %6432 = vmatmul.mubr.msk.bf16.vlgmr.msra.gmra.mrb[0].mxu0 %vm192_vm2, %v8216_v50  ;;  %4642 = vrot.lane.b32.xlu1 %v7088_v14, %s7038_s29  ;;  %v3774_v6 = vpop.permute.xlu0 %3773 }
 0x199   : > { %v8227_v35 = vpop.permute.xlu1 %3775  ;;  %3723 = vmatpush1.bf16.msra.mxu0 %v3635_v28  ;;  %3754 = vmatprep.mubr.bf16.mxu0 %v8841_v18  ;;  %v3786_v53 = vsel %vm3785_vm9, %v3772_v7, %v3774_v6  ;;  %v8268_v28 = vld [vmem:[%s8829_s1 + $0x54] sm:$0xf] }
 0x19a   : > { %v3787_v2 = vsel %vm3785_vm9, %v3774_v6, %v8227_v35  ;;  %5155 = vrot.lane.b32.xlu0 %v7074_v10, %s7041_s17  ;;  %6385 = vmatmul.mubr.msk.bf16.vlgmr.msra.gmra.mrb[4].mxu1 %vm192_vm2, %v7763_v39  ;;  %v3796_v10 = vsel %vm196_vm1, %v3786_v53, 0 }
 0x19b   : > { %2644 = vmatpush1.bf16.msra.mxu1 %v2591_v44  ;;  %6438 = vmatprep.subr.msk.bf16.mxu0 %vm196_vm1, %v3787_v2 }
 0x19c   : > { %5157 = vrot.lane.b32.xlu1 %v7081_v12, %s7041_s17  ;;  %6398 = vmatprep.subr.msk.bf16.mxu1 %vm196_vm1, %v2751_v21  ;;  %v2913_v31 = vpop.permute.xlu0 %2912 }
 0x19d   : > { %v8244_v29 = vpop.permute.xlu1 %3779  ;;  %2675 = vmatprep.mubr.bf16.mxu1 %v8841_v18  ;;  %v2924_v4 = vsel %vm2920_vm12, %v2913_v31, %v7989_v38 }
 0x19e   : > { %5159 = vrot.lane.b32.xlu0 %v7076_v11, %s7041_s17 }
 0x1a0   : > { %6436 = vmatmul.mubr.msk.bf16.vlgmr.msra.gmra.mrb[4].mxu0 %vm192_vm2, %v8216_v50  ;;  %5163 = vrot.lane.b32.xlu1 %v7083_v13, %s7041_s17  ;;  %v3782_v39 = vpop.permute.xlu0 %3781 }
 0x1a1   : > { %v3784_v33 = vpop.permute.xlu1 %3783  ;;  %3814 = vmatpush1.bf16.msra.mxu0 %v3796_v10  ;;  %3845 = vmatprep.mubr.bf16.mxu0 %v8841_v18  ;;  %v3790_v8 = vsel %vm3785_vm9, %v8244_v29, %v3782_v39 }
 0x1a2   : > { %v3791_v9 = vsel %vm3785_vm9, %v3782_v39, %v3784_v33  ;;  %5165 = vrot.lane.b32.xlu0 %v7094_v16, %s7041_s17  ;;  %v3808_v6 = vsel %vm196_vm1, %v3790_v8, 0  ;;  %v2923_v39 = vsel %vm2920_vm12, %v7976_v37, %v2913_v31  ;;  %vm4650_vm12 = vcmask 179200  }
 0x1a3   : > { %6442 = vmatprep.subr.msk.bf16.mxu0 %vm196_vm1, %v3791_v9  ;;  %v2937_v8 = vsel %vm196_vm1, %v2923_v39, 0 }
 0x1a4   : > { %5167 = vrot.lane.b32.xlu1 %v7096_v17, %s7041_s17  ;;  %v3945_v34 = vpop.permute.xlu0 %3944 }
 0x1a5   : > { %v3947_v7 = vpop.permute.xlu1 %3946 }
 0x1a6   : > { %4815 = vrot.lane.b32.xlu0 %v7088_v14, %s7039_s11  ;;  %6392 = vmatmul.mubr.msk.bf16.vlgmr.msra.gmra.mrb[4].mxu1 %vm192_vm2, %v7842_v20  ;;  %v3959_v38 = vsel %vm3958_vm11, %v3945_v34, %v3947_v7 }
 0x1a7   : > { %2817 = vmatpush1.bf16.msra.mxu1 %v2764_v40  ;;  %2848 = vmatprep.mubr.bf16.mxu1 %v8841_v18  ;;  %v3969_v10 = vsel %vm196_vm1, %v3959_v38, 0  ;;  %v8327_v40 = vld [vmem:[%s8829_s1 + $0x58] sm:$0xf] }
 0x1a8   : > { %6439 = vmatmul.mubr.msk.bf16.vlgmr.msra.gmra.mrb[0].mxu0 %vm192_vm2, %v8268_v28  ;;  %4988 = vrot.lane.b32.xlu1 %v7088_v14, %s7040_s13  ;;  %v8287_v44 = vpop.permute.xlu0 %3948 }
 0x1a9   : > { %6405 = vmatprep.subr.msk.bf16.mxu1 %vm196_vm1, %v2924_v4  ;;  %v3960_v20 = vsel %vm3958_vm11, %v3947_v7, %v8287_v44  ;;  %v3086_v2 = vpop.permute.xlu1 %3085  ;;  %3896 = vmatpush1.bf16.msra.mxu0 %v3808_v6 }
 0x1aa   : > { %5329 = vrot.lane.b32.xlu0 %v8278_v57, %s7014_s18  ;;  %3927 = vmatprep.mubr.bf16.mxu0 %v8841_v18  ;;  %v3097_v37 = vsel %vm3093_vm14, %v3086_v2, %v8033_v56 }
 0x1ab   : > { %6445 = vmatprep.subr.msk.bf16.mxu0 %vm196_vm1, %v3960_v20  ;;  %v3096_v20 = vsel %vm3093_vm14, %v8031_v0, %v3086_v2  ;;  %vm4823_vm14 = vcmask 171008  }
 0x1ac   : > { %5161 = vrot.lane.b32.xlu1 %v7088_v14, %s7041_s17  ;;  %v8299_v21 = vpop.permute.xlu0 %3952  ;;  %v3110_v39 = vsel %vm196_vm1, %v3096_v20, 0 }
 0x1ad   : > { %v3955_v53 = vpop.permute.xlu1 %3954 }
 0x1ae   : > { %5469 = vrot.lane.b32.xlu0 %v8278_v57, %s7015_s19  ;;  %v3963_v31 = vsel %vm3958_vm11, %v8299_v21, %v3955_v53 }
 0x1b0   : > { %6443 = vmatmul.mubr.msk.bf16.vlgmr.msra.gmra.mrb[4].mxu0 %vm192_vm2, %v8268_v28  ;;  %5609 = vrot.lane.b32.xlu1 %v8278_v57, %s7016_s20  ;;  %v3957_v33 = vpop.permute.xlu0 %3956  ;;  %s7042_s20 = smov 122  }
 0x1b1   : > { %v3964_v9 = vsel %vm3958_vm11, %v3955_v53, %v3957_v33  ;;  %v3259_v63 = vpop.permute.xlu1 %3258  ;;  %3987 = vmatpush1.bf16.msra.mxu0 %v3969_v10  ;;  %4018 = vmatprep.mubr.bf16.mxu0 %v8841_v18 }
 0x1b2   : > { %5749 = vrot.lane.b32.xlu0 %v8278_v57, %s7019_s23  ;;  %6399 = vmatmul.mubr.msk.bf16.vlgmr.msra.gmra.mrb[4].mxu1 %vm192_vm2, %v7929_v58  ;;  %v3981_v58 = vsel %vm196_vm1, %v3963_v31, 0  ;;  %v3270_v0 = vsel %vm3266_vm4, %v3259_v63, %v8093_v52 }
 0x1b3   : > { %2990 = vmatpush1.bf16.msra.mxu1 %v2937_v8  ;;  %6449 = vmatprep.subr.msk.bf16.mxu0 %vm196_vm1, %v3964_v9 }
 0x1b4   : > { %6412 = vmatprep.subr.msk.bf16.mxu1 %vm196_vm1, %v3097_v37  ;;  %v4118_v34 = vpop.permute.xlu0 %4117  ;;  %3021 = vmatprep.mubr.bf16.mxu1 %v8841_v18  ;;  %v8375_v37 = vld [vmem:[%s8829_s1 + $0x5c] sm:$0xf] }
 0x1b5   : > { %v4120_v7 = vpop.permute.xlu1 %4119  ;;  %5889 = vrot.lane.b32.xlu1 %v7081_v12, %s7042_s20 }
 0x1b6   : > { %5891 = vrot.lane.b32.xlu0 %v7076_v11, %s7042_s20  ;;  %v4132_v38 = vsel %vm4131_vm13, %v4118_v34, %v4120_v7 }
 0x1b7   : > { %v4142_v33 = vsel %vm196_vm1, %v4132_v38, 0 }
 0x1b8   : > { %6446 = vmatmul.mubr.msk.bf16.vlgmr.msra.gmra.mrb[0].mxu0 %vm192_vm2, %v8327_v40  ;;  %v8336_v56 = vpop.permute.xlu0 %4121 }
 0x1b9   : > { %v4133_v6 = vsel %vm4131_vm13, %v4120_v7, %v8336_v56  ;;  %v8340_v4 = vpop.permute.xlu1 %4125  ;;  %4069 = vmatpush1.bf16.msra.mxu0 %v3981_v58  ;;  %4100 = vmatprep.mubr.bf16.mxu0 %v8841_v18  ;;  %v3269_v7 = vsel %vm3266_vm4, %v8081_v43, %v3259_v63  ;;  %vm4996_vm4 = vcmask 162816  }
 0x1ba   : > { %6452 = vmatprep.subr.msk.bf16.mxu0 %vm196_vm1, %v4133_v6  ;;  %5893 = vrot.lane.b32.xlu1 %v7088_v14, %s7042_s20 }
 0x1bb   : > { %5897 = vrot.lane.b32.xlu0 %v7094_v16, %s7042_s20 }
 0x1bc   : > { %v4128_v53 = vpop.permute.xlu0 %4127 }
 0x1bd   : > { %v4130_v10 = vpop.permute.xlu1 %4129 }
 0x1be   : > { %6406 = vmatmul.mubr.msk.bf16.vlgmr.msra.gmra.mrb[4].mxu1 %vm192_vm2, %v7994_v55  ;;  %5899 = vrot.lane.b32.xlu1 %v7096_v17, %s7042_s20  ;;  %v4137_v2 = vsel %vm4131_vm13, %v4128_v53, %v4130_v10  ;;  %v4136_v55 = vsel %vm4131_vm13, %v8340_v4, %v4128_v53 }
 0x1bf   : > { %3163 = vmatpush1.bf16.msra.mxu1 %v3110_v39  ;;  %3194 = vmatprep.mubr.bf16.mxu1 %v8841_v18  ;;  %v4154_v31 = vsel %vm196_vm1, %v4136_v55, 0 }
 0x1c0   : > { %6450 = vmatmul.mubr.msk.bf16.vlgmr.msra.gmra.mrb[4].mxu0 %vm192_vm2, %v8327_v40  ;;  %6419 = vmatprep.subr.msk.bf16.mxu1 %vm196_vm1, %v3270_v0  ;;  %v3432_v9 = vpop.permute.xlu0 %3431 }
 0x1c1   : > { %v4291_v8 = vpop.permute.xlu1 %4290  ;;  %4160 = vmatpush1.bf16.msra.mxu0 %v4142_v33  ;;  %4191 = vmatprep.mubr.bf16.mxu0 %v8841_v18 }
 0x1c2   : > { %6456 = vmatprep.subr.msk.bf16.mxu0 %vm196_vm1, %v4137_v2  ;;  %5901 = vrot.lane.b32.xlu0 %v8278_v57, %s7042_s20 }
 0x1c3   : > { %5895 = vrot.lane.b32.xlu1 %v7083_v13, %s7042_s20 }
 0x1c4   : > { %v4293_v52 = vpop.permute.xlu0 %4292 }
 0x1c6   : > { %v8378_v34 = vpop.permute.xlu1 %4294  ;;  %6062 = vrot.lane.b32.xlu0 %v7081_v12, %s7043_s28  ;;  %v3283_v12 = vsel %vm196_vm1, %v3269_v7, 0 }
 0x1c7   : > { %v4306_v58 = vsel %vm4304_vm15, %v4293_v52, %v8378_v34  ;;  %6064 = vrot.lane.b32.xlu1 %v7076_v11, %s7043_s28  ;;  %v3443_v11 = vsel %vm3439_vm6, %v3432_v9, %v8145_v5 }
 0x1c8   : > { %6453 = vmatmul.mubr.msk.bf16.vlgmr.msra.gmra.mrb[0].mxu0 %vm192_vm2, %v8375_v37  ;;  %v3605_v6 = vpop.permute.xlu0 %3604 }
 0x1c9   : > { %v3615_v20 = vsel %vm3612_vm8, %v8183_v61, %v3605_v6  ;;  %v3616_v38 = vsel %vm3612_vm8, %v3605_v6, %v8187_v46  ;;  %4242 = vmatpush1.bf16.msra.mxu0 %v4154_v31  ;;  %4273 = vmatprep.mubr.bf16.mxu0 %v8841_v18  ;;  %v4305_v61 = vsel %vm4304_vm15, %v4291_v8, %v4293_v52 }
 0x1ca   : > { %v8396_v43 = vpop.permute.xlu1 %4298  ;;  %6413 = vmatmul.mubr.msk.bf16.vlgmr.msra.gmra.mrb[4].mxu1 %vm192_vm2, %v8054_v47  ;;  %6459 = vmatprep.subr.msk.bf16.mxu0 %vm196_vm1, %v4306_v58  ;;  %v4315_v47 = vsel %vm196_vm1, %v4305_v61, 0  ;;  %v3629_v6 = vsel %vm196_vm1, %v3615_v20, 0  ;;  %v8474_v20 = vld [vmem:[%s8829_s1 + $0x64] sm:$0xf] }
 0x1cb   : > { %3336 = vmatpush1.bf16.msra.mxu1 %v3283_v12  ;;  %3367 = vmatprep.mubr.bf16.mxu1 %v8841_v18 }
 0x1cc   : > { %6426 = vmatprep.subr.msk.bf16.mxu1 %vm196_vm1, %v3443_v11  ;;  %v4301_v46 = vpop.permute.xlu0 %4300  ;;  %6066 = vrot.lane.b32.xlu0 %v7088_v14, %s7043_s28  ;;  %v3442_v14 = vsel %vm3439_vm6, %v8131_v26, %v3432_v9  ;;  %vm5169_vm6 = vcmask 154624  }
 0x1cd   : > { %6070 = vrot.lane.b32.xlu1 %v7094_v16, %s7043_s28  ;;  %v4309_v16 = vsel %vm4304_vm15, %v8396_v43, %v4301_v46  ;;  %v3456_v33 = vsel %vm196_vm1, %v3442_v14, 0 }
 0x1ce   : > { %v4303_v63 = vpop.permute.xlu1 %4302 }
 0x1cf   : > { %v4310_v53 = vsel %vm4304_vm15, %v4301_v46, %v4303_v63 }
 0x1d0   : > { %6457 = vmatmul.mubr.msk.bf16.vlgmr.msra.gmra.mrb[4].mxu0 %vm192_vm2, %v8375_v37  ;;  %v4464_v5 = vpop.permute.xlu0 %4463  ;;  %6072 = vrot.lane.b32.xlu0 %v7096_v17, %s7043_s28  ;;  %v8431_v17 = vld [vmem:[%s8829_s1 + $0x60] sm:$0xf] }
 0x1d1   : > { %4333 = vmatpush1.bf16.msra.mxu0 %v4315_v47  ;;  %4364 = vmatprep.mubr.bf16.mxu0 %v8841_v18 }
 0x1d2   : > { %v4466_v10 = vpop.permute.xlu1 %4465  ;;  %6463 = vmatprep.subr.msk.bf16.mxu0 %vm196_vm1, %v4310_v53  ;;  %6074 = vrot.lane.b32.xlu1 %v8278_v57, %s7043_s28  ;;  %v4327_v57 = vsel %vm196_vm1, %v4309_v16, 0 }
 0x1d4   : > { %v8424_v39 = vpop.permute.xlu0 %4467  ;;  %6068 = vrot.lane.b32.xlu0 %v7083_v13, %s7043_s28  ;;  %s6289_s28 = sshll.u32 %s8847_s27, 3 }
 0x1d5   : > { %v4479_v26 = vsel %vm4477_vm0, %v4466_v10, %v8424_v39  ;;  %s123_s3 = scalar_lea.vmem %s8830_s2, %s6289_s28 }
 0x1d6   : > { %v3778_v0 = vpop.permute.xlu1 %3777  ;;  %6420 = vmatmul.mubr.msk.bf16.vlgmr.msra.gmra.mrb[4].mxu1 %vm192_vm2, %v8107_v19 }
 0x1d7   : > { %v3788_v2 = vsel %vm3785_vm9, %v8227_v35, %v3778_v0  ;;  %v3789_v13 = vsel %vm3785_vm9, %v3778_v0, %v8244_v29  ;;  %3509 = vmatpush1.bf16.msra.mxu1 %v3456_v33  ;;  %3540 = vmatprep.mubr.bf16.mxu1 %v8841_v18  ;;  %v4478_v35 = vsel %vm4477_vm0, %v4464_v5, %v4466_v10 }
 0x1d8   : > { %6460 = vmatmul.mubr.msk.bf16.vlgmr.msra.gmra.mrb[0].mxu0 %vm192_vm2, %v8431_v17  ;;  %6433 = vmatprep.subr.msk.bf16.mxu1 %vm196_vm1, %v3616_v38  ;;  %v8447_v9 = vpop.permute.xlu0 %4471  ;;  %v4488_v29 = vsel %vm196_vm1, %v4478_v35, 0  ;;  %v3802_v5 = vsel %vm196_vm1, %v3788_v2, 0 }
 0x1d9   : > { %4415 = vmatpush1.bf16.msra.mxu0 %v4327_v57  ;;  %4446 = vmatprep.mubr.bf16.mxu0 %v8841_v18 }
 0x1da   : > { %v4474_v19 = vpop.permute.xlu1 %4473  ;;  %6466 = vmatprep.subr.msk.bf16.mxu0 %vm196_vm1, %v4479_v26  ;;  %v8508_v26 = vld [vmem:[%s8829_s1 + $0x68] sm:$0xf] }
 0x1dc   : > { %v4476_v8 = vpop.permute.xlu0 %4475 }
 0x1dd   : > { %v4483_v52 = vsel %vm4477_vm0, %v4474_v19, %v4476_v8 }
 0x1de   : > { %v3951_v55 = vpop.permute.xlu1 %3950 }
 0x1df   : > { %v3961_v31 = vsel %vm3958_vm11, %v8287_v44, %v3951_v55  ;;  %v3962_v7 = vsel %vm3958_vm11, %v3951_v55, %v8299_v21  ;;  %v4482_v44 = vsel %vm4477_vm0, %v8447_v9, %v4474_v19 }
 0x1e0   : > { %6464 = vmatmul.mubr.msk.bf16.vlgmr.msra.gmra.mrb[4].mxu0 %vm192_vm2, %v8431_v17  ;;  %v4637_v58 = vpop.permute.xlu0 %4636 }
 0x1e1   : > { %4506 = vmatpush1.bf16.msra.mxu0 %v4488_v29  ;;  %4537 = vmatprep.mubr.bf16.mxu0 %v8841_v18 }
 0x1e2   : > { %v4639_v38 = vpop.permute.xlu1 %4638  ;;  %6427 = vmatmul.mubr.msk.bf16.vlgmr.msra.gmra.mrb[4].mxu1 %vm192_vm2, %v8165_v32  ;;  %6470 = vmatprep.subr.msk.bf16.mxu0 %vm196_vm1, %v4483_v52  ;;  %v4500_v32 = vsel %vm196_vm1, %v4482_v44, 0 }
 0x1e3   : > { %3682 = vmatpush1.bf16.msra.mxu1 %v3629_v6  ;;  %3713 = vmatprep.mubr.bf16.mxu1 %v8841_v18  ;;  %v4651_v47 = vsel %vm4650_vm12, %v4637_v58, %v4639_v38 }
 0x1e4   : > { %6440 = vmatprep.subr.msk.bf16.mxu1 %vm196_vm1, %v3789_v13  ;;  %v8469_v21 = vpop.permute.xlu0 %4640  ;;  %v4661_v10 = vsel %vm196_vm1, %v4651_v47, 0 }
 0x1e5   : > { %v4652_v11 = vsel %vm4650_vm12, %v4639_v38, %v8469_v21 }
 0x1e6   : > { %v8477_v12 = vpop.permute.xlu1 %4644 }
 0x1e8   : > { %6467 = vmatmul.mubr.msk.bf16.vlgmr.msra.gmra.mrb[0].mxu0 %vm192_vm2, %v8474_v20  ;;  %v4647_v61 = vpop.permute.xlu0 %4646 }
 0x1e9   : > { %4588 = vmatpush1.bf16.msra.mxu0 %v4500_v32  ;;  %4619 = vmatprep.mubr.bf16.mxu0 %v8841_v18  ;;  %v8544_v32 = vld [vmem:[%s8829_s1 + $0x6c] sm:$0xf] }
 0x1ea   : > { %v4649_v46 = vpop.permute.xlu1 %4648  ;;  %6473 = vmatprep.subr.msk.bf16.mxu0 %vm196_vm1, %v4652_v11 }
 0x1eb   : > { %v4656_v16 = vsel %vm4650_vm12, %v4647_v61, %v4649_v46 }
 0x1ec   : > { %v4124_v63 = vpop.permute.xlu0 %4123 }
 0x1ed   : > { %v4134_v53 = vsel %vm4131_vm13, %v8336_v56, %v4124_v63  ;;  %v4135_v29 = vsel %vm4131_vm13, %v4124_v63, %v8340_v4 }
 0x1ee   : > { %v4810_v14 = vpop.permute.xlu1 %4809  ;;  %6434 = vmatmul.mubr.msk.bf16.vlgmr.msra.gmra.mrb[4].mxu1 %vm192_vm2, %v8216_v50  ;;  %v4655_v50 = vsel %vm4650_vm12, %v8477_v12, %v4647_v61  ;;  %v4148_v11 = vsel %vm196_vm1, %v4134_v53, 0 }
 0x1ef   : > { %3855 = vmatpush1.bf16.msra.mxu1 %v3802_v5  ;;  %3886 = vmatprep.mubr.bf16.mxu1 %v8841_v18  ;;  %v4673_v2 = vsel %vm196_vm1, %v4655_v50, 0 }
 0x1f0   : > { %6471 = vmatmul.mubr.msk.bf16.vlgmr.msra.gmra.mrb[4].mxu0 %vm192_vm2, %v8474_v20  ;;  %6447 = vmatprep.subr.msk.bf16.mxu1 %vm196_vm1, %v3962_v7  ;;  %v4812_v33 = vpop.permute.xlu0 %4811 }
 0x1f1   : > { %4679 = vmatpush1.bf16.msra.mxu0 %v4661_v10  ;;  %4710 = vmatprep.mubr.bf16.mxu0 %v8841_v18  ;;  %v4824_v55 = vsel %vm4823_vm14, %v4810_v14, %v4812_v33 }
 0x1f2   : > { %v8498_v56 = vpop.permute.xlu1 %4813  ;;  %6477 = vmatprep.subr.msk.bf16.mxu0 %vm196_vm1, %v4656_v16  ;;  %v4834_v7 = vsel %vm196_vm1, %v4824_v55, 0 }
 0x1f3   : > { %v4825_v19 = vsel %vm4823_vm14, %v4812_v33, %v8498_v56 }
 0x1f4   : > { %v4297_v57 = vpop.permute.xlu0 %4296 }
 0x1f5   : > { %v4307_v0 = vsel %vm4304_vm15, %v8378_v34, %v4297_v57  ;;  %v3975_v34 = vsel %vm196_vm1, %v3961_v31, 0  ;;  %v4308_v47 = vsel %vm4304_vm15, %v4297_v57, %v8396_v43  ;;  %v8581_v57 = vld [vmem:[%s8829_s1 + $0x70] sm:$0xf] }
 0x1f6   : > { %v8511_v13 = vpop.permute.xlu1 %4817  ;;  %v4321_v16 = vsel %vm196_vm1, %v4307_v0, 0 }
 0x1f8   : > { %6474 = vmatmul.mubr.msk.bf16.vlgmr.msra.gmra.mrb[0].mxu0 %vm192_vm2, %v8508_v26  ;;  %v4820_v35 = vpop.permute.xlu0 %4819 }
 0x1f9   : > { %4761 = vmatpush1.bf16.msra.mxu0 %v4673_v2  ;;  %4792 = vmatprep.mubr.bf16.mxu0 %v8841_v18  ;;  %v4828_v6 = vsel %vm4823_vm14, %v8511_v13, %v4820_v35 }
 0x1fa   : > { %v4822_v8 = vpop.permute.xlu1 %4821  ;;  %6441 = vmatmul.mubr.msk.bf16.vlgmr.msra.gmra.mrb[4].mxu1 %vm192_vm2, %v8268_v28  ;;  %6480 = vmatprep.subr.msk.bf16.mxu0 %vm196_vm1, %v4825_v19  ;;  %v4846_v61 = vsel %vm196_vm1, %v4828_v6, 0 }
 0x1fb   : > { %4028 = vmatpush1.bf16.msra.mxu1 %v3975_v34  ;;  %4059 = vmatprep.mubr.bf16.mxu1 %v8841_v18  ;;  %v4829_v58 = vsel %vm4823_vm14, %v4820_v35, %v4822_v8 }
 0x1fc   : > { %6454 = vmatprep.subr.msk.bf16.mxu1 %vm196_vm1, %v4135_v29  ;;  %v4983_v52 = vpop.permute.xlu0 %4982 }
 0x1fe   : > { %v4985_v31 = vpop.permute.xlu1 %4984 }
 0x200   : > { %6478 = vmatmul.mubr.msk.bf16.vlgmr.msra.gmra.mrb[4].mxu0 %vm192_vm2, %v8508_v26  ;;  %v8531_v28 = vpop.permute.xlu0 %4986 }
 0x201   : > { %4852 = vmatpush1.bf16.msra.mxu0 %v4834_v7  ;;  %4883 = vmatprep.mubr.bf16.mxu0 %v8841_v18 }
 0x202   : > { %v4470_v4 = vpop.permute.xlu1 %4469  ;;  %6484 = vmatprep.subr.msk.bf16.mxu0 %vm196_vm1, %v4829_v58 }
 0x203   : > { %v4480_v38 = vsel %vm4477_vm0, %v8424_v39, %v4470_v4  ;;  %v4998_v39 = vsel %vm4996_vm4, %v4985_v31, %v8531_v28 }
 0x204   : > { %v8539_v44 = vpop.permute.xlu0 %4990  ;;  %v4494_v35 = vsel %vm196_vm1, %v4480_v38, 0 }
 0x206   : > { %v4993_v46 = vpop.permute.xlu1 %4992  ;;  %6448 = vmatmul.mubr.msk.bf16.vlgmr.msra.gmra.mrb[4].mxu1 %vm192_vm2, %v8327_v40  ;;  %v4997_v40 = vsel %vm4996_vm4, %v4983_v52, %v4985_v31 }
 0x207   : > { %4201 = vmatpush1.bf16.msra.mxu1 %v4148_v11  ;;  %4232 = vmatprep.mubr.bf16.mxu1 %v8841_v18  ;;  %v5007_v5 = vsel %vm196_vm1, %v4997_v40, 0  ;;  %v5001_v50 = vsel %vm4996_vm4, %v8539_v44, %v4993_v46  ;;  %v524_v40 = vsel %vm196_vm1, %v7385_v15, 0 }
 0x208   : > { %6481 = vmatmul.mubr.msk.bf16.vlgmr.msra.gmra.mrb[0].mxu0 %vm192_vm2, %v8544_v32  ;;  %6461 = vmatprep.subr.msk.bf16.mxu1 %vm196_vm1, %v4308_v47  ;;  %v4995_v63 = vpop.permute.xlu0 %4994  ;;  %v512_v47 = vsel %vm196_vm1, %v7316_v54, 0 }
 0x209   : > { %4934 = vmatpush1.bf16.msra.mxu0 %v4846_v61  ;;  %4965 = vmatprep.mubr.bf16.mxu0 %v8841_v18  ;;  %v5002_v10 = vsel %vm4996_vm4, %v4993_v46, %v4995_v63 }
 0x20a   : > { %v4643_v53 = vpop.permute.xlu1 %4642  ;;  %6487 = vmatprep.subr.msk.bf16.mxu0 %vm196_vm1, %v4998_v39  ;;  %v8647_v39 = vld [vmem:[%s8829_s1 + $0x78] sm:$0xf] }
 0x20b   : > { %v4653_v43 = vsel %vm4650_vm12, %v8469_v21, %v4643_v53  ;;  %v4481_v21 = vsel %vm4477_vm0, %v4470_v4, %v8447_v9  ;;  %v4654_v55 = vsel %vm4650_vm12, %v4643_v53, %v8477_v12  ;;  %v8615_v12 = vld [vmem:[%s8829_s1 + $0x74] sm:$0xf] }
 0x20c   : > { %v5156_v14 = vpop.permute.xlu0 %5155  ;;  %v4667_v11 = vsel %vm196_vm1, %v4653_v43, 0 }
 0x20e   : > { %v5158_v33 = vpop.permute.xlu1 %5157 }
 0x20f   : > { %v5170_v19 = vsel %vm5169_vm6, %v5156_v14, %v5158_v33 }
 0x210   : > { %6485 = vmatmul.mubr.msk.bf16.vlgmr.msra.gmra.mrb[4].mxu0 %vm192_vm2, %v8544_v32  ;;  %v8584_v0 = vpop.permute.xlu0 %5159  ;;  %v5180_v34 = vsel %vm196_vm1, %v5170_v19, 0 }
 0x211   : > { %5025 = vmatpush1.bf16.msra.mxu0 %v5007_v5  ;;  %5056 = vmatprep.mubr.bf16.mxu0 %v8841_v18  ;;  %v5171_v9 = vsel %vm5169_vm6, %v5158_v33, %v8584_v0  ;;  %v685_v5 = vsel %vm196_vm1, %v7421_v27, 0  ;;  %v697_v27 = vsel %vm196_vm1, %v7496_v48, 0  ;;  %v858_v48 = vsel %vm196_vm1, %v7528_v49, 0  ;;  %v8713_v33 = vld [vmem:[%s8829_s1 + $0x80] sm:$0xf] }
 0x212   : > { %6455 = vmatmul.mubr.msk.bf16.vlgmr.msra.gmra.mrb[4].mxu1 %vm192_vm2, %v8375_v37  ;;  %6491 = vmatprep.subr.msk.bf16.mxu0 %vm196_vm1, %v5002_v10  ;;  %v5019_v37 = vsel %vm196_vm1, %v5001_v50, 0  ;;  %v8588_v2 = vpop.permute.xlu1 %5163 }
 0x213   : > { %4374 = vmatpush1.bf16.msra.mxu1 %v4321_v16  ;;  %4405 = vmatprep.mubr.bf16.mxu1 %v8841_v18 }
 0x214   : > { %6468 = vmatprep.subr.msk.bf16.mxu1 %vm196_vm1, %v4481_v21  ;;  %v5166_v8 = vpop.permute.xlu0 %5165 }
 0x216   : > { %v5168_v29 = vpop.permute.xlu1 %5167 }
 0x217   : > { %v5175_v52 = vsel %vm5169_vm6, %v5166_v8, %v5168_v29  ;;  %v8843_v29 = vld [vmem:[#allocation2_spill] sm:$0xff] }
 0x218   : > { %6488 = vmatmul.mubr.msk.bf16.vlgmr.msra.gmra.mrb[0].mxu0 %vm192_vm2, %v8581_v57  ;;  %v4816_v6 = vpop.permute.xlu0 %4815 }
 0x219   : > { %5107 = vmatpush1.bf16.msra.mxu0 %v5019_v37  ;;  %5138 = vmatprep.mubr.bf16.mxu0 %v8841_v18  ;;  %v4827_v61 = vsel %vm4823_vm14, %v4816_v6, %v8511_v13  ;;  %v8742_v37 = vld [vmem:[%s8829_s1 + $0x84] sm:$0xf] }
 0x21a   : > { %6494 = vmatprep.subr.msk.bf16.mxu0 %vm196_vm1, %v5171_v9  ;;  %v4989_v63 = vpop.permute.xlu1 %4988  ;;  %v8842_v9 = vld [vmem:[#allocation3_spill] sm:$0xff] }
 0x21c   : > { %v5330_v46 = vpop.permute.xlu0 %5329 }
 0x21e   : > { %6462 = vmatmul.mubr.msk.bf16.vlgmr.msra.gmra.mrb[4].mxu1 %vm192_vm2, %v8431_v17  ;;  %v5174_v17 = vsel %vm5169_vm6, %v8588_v2, %v5166_v8  ;;  %v5162_v14 = vpop.permute.xlu1 %5161 }
 0x21f   : > { %4547 = vmatpush1.bf16.msra.mxu1 %v4494_v35  ;;  %4578 = vmatprep.mubr.bf16.mxu1 %v8841_v18  ;;  %v5192_v31 = vsel %vm196_vm1, %v5174_v17, 0  ;;  %v8844_v17 = vld [vmem:[#allocation5_spill] sm:$0xff] }
 0x220   : > { %6492 = vmatmul.mubr.msk.bf16.vlgmr.msra.gmra.mrb[4].mxu0 %vm192_vm2, %v8581_v57  ;;  %6475 = vmatprep.subr.msk.bf16.mxu1 %vm196_vm1, %v4654_v55  ;;  %v864_v55 = vsel %vm196_vm1, %v8843_v29, 0 }
 0x221   : > { %5198 = vmatpush1.bf16.msra.mxu0 %v5180_v34  ;;  %5229 = vmatprep.mubr.bf16.mxu0 %v8841_v18 }
 0x222   : > { %6498 = vmatprep.subr.msk.bf16.mxu0 %vm196_vm1, %v5175_v52  ;;  %v5610_v16 = vpop.permute.xlu1 %5609 }
 0x225   : > { %v8610_v7 = vpop.f32.mrb[0].mxu1 }
 0x226   : > { %v8618_v58 = vpop.f32.mrb[1].mxu1 }
 0x227   : > { %v1602_v4 = vpop.f32.mrb[2].mxu1  ;;  %v5890_v49 = vpop.permute.xlu1 %5889 }
 0x228   : > { %6495 = vmatmul.mubr.msk.bf16.vlgmr.msra.gmra.mrb[0].mxu0 %vm192_vm2, %v8615_v12  ;;  %v1603_v38 = vpop.f32.mrb[3].mxu1 }
 0x229   : > { %5280 = vmatpush1.bf16.msra.mxu0 %v5192_v31  ;;  %5311 = vmatprep.mubr.bf16.mxu0 %v8841_v18  ;;  %v6528_v31 = vld [vmem:[%s8829_s1 + $0x88] sm:$0xf] }
 0x22a   : > { %6501 = vmatprep.subr.msk.bf16.mxu0 %vm196_vm1, %v7359_v3  ;;  %6469 = vmatmul.mubr.msk.bf16.vlgmr.msra.gmra.mrb[4].mxu1 %vm192_vm2, %v8474_v20  ;;  %v5331_v3 = vsel %vm498_vm3, %v7260_v42, %v5330_v46  ;;  %v4826_v20 = vsel %vm4823_vm14, %v8498_v56, %v4816_v6  ;;  %v5000_v42 = vsel %vm4996_vm4, %v4989_v63, %v8539_v44  ;;  %vm5903_vm3 = vcmask 998400  }
 0x22b   : > { %4720 = vmatpush1.bf16.msra.mxu1 %v4667_v11  ;;  %4751 = vmatprep.mubr.bf16.mxu1 %v8841_v18  ;;  %v4840_v54 = vsel %vm196_vm1, %v4826_v20, 0  ;;  %v4999_v44 = vsel %vm4996_vm4, %v8531_v28, %v4989_v63  ;;  %v5172_v28 = vsel %vm5169_vm6, %v8584_v0, %v5162_v14  ;;  %v1043_v0 = vsel %vm196_vm1, %v7716_v59, 0 }
 0x22c   : > { %6482 = vmatprep.subr.msk.bf16.mxu1 %vm196_vm1, %v4827_v61  ;;  %v5013_v10 = vsel %vm196_vm1, %v4999_v44, 0  ;;  %v8733_v50 = vpop.permute.xlu1 %5893 }
 0x230   : > { %6499 = vmatmul.mubr.msk.bf16.vlgmr.msra.gmra.mrb[4].mxu0 %vm192_vm2, %v8615_v12 }
 0x231   : > { %5339 = vmatpush1.bf16.msra.mxu0 %v512_v47  ;;  %5370 = vmatprep.mubr.bf16.mxu0 %v8841_v18 }
 0x232   : > { %6505 = vmatprep.subr.msk.bf16.mxu0 %vm196_vm1, %v5331_v3  ;;  %v8845_v3 = vld [vmem:[#allocation4_spill] sm:$0xff] }
 0x233   : > { %v1037_v20 = vsel %vm196_vm1, %v8845_v3, 0 }
 0x235   : > { %v8642_v13 = vpop.f32.mrb[8].mxu1 }
 0x236   : > { %v8650_v53 = vpop.f32.mrb[9].mxu1  ;;  %6476 = vmatmul.mubr.msk.bf16.vlgmr.msra.gmra.mrb[4].mxu1 %vm192_vm2, %v8508_v26  ;;  %v5470_v26 = vpop.permute.xlu0 %5469 }
 0x237   : > { %4893 = vmatpush1.bf16.msra.mxu1 %v4840_v54  ;;  %v1684_v56 = vpop.f32.mrb[10].mxu1  ;;  %4924 = vmatprep.mubr.bf16.mxu1 %v8841_v18  ;;  %v5471_v15 = vsel %vm671_vm5, %v7303_v51, %v5470_v26  ;;  %v8685_v51 = vld [vmem:[%s8829_s1 + $0x7c] sm:$0xf]  ;;  %vm6076_vm5 = vcmask 990208  }
 0x238   : > { %6502 = vmatmul.mubr.msk.bf16.vlgmr.msra.gmra.mrb[0].mxu0 %vm192_vm2, %v8647_v39  ;;  %6489 = vmatprep.subr.msk.bf16.mxu1 %vm196_vm1, %v5000_v42  ;;  %v1685_v43 = vpop.f32.mrb[11].mxu1  ;;  %v6535_v42 = vld [vmem:[%s8829_s1 + $0x8c] sm:$0xf] }
 0x239   : > { %5421 = vmatpush1.bf16.msra.mxu0 %v524_v40  ;;  %5452 = vmatprep.mubr.bf16.mxu0 %v8841_v18 }
 0x23a   : > { %6508 = vmatprep.subr.msk.bf16.mxu0 %vm196_vm1, %v7473_v41  ;;  %v5173_v41 = vsel %vm5169_vm6, %v5162_v14, %v8588_v2  ;;  %v5750_v21 = vpop.permute.xlu0 %5749 }
 0x240   : > { %6506 = vmatmul.mubr.msk.bf16.vlgmr.msra.gmra.mrb[4].mxu0 %vm192_vm2, %v8647_v39 }
 0x241   : > { %5479 = vmatpush1.bf16.msra.mxu0 %v685_v5  ;;  %5510 = vmatprep.mubr.bf16.mxu0 %v8841_v18 }
 0x242   : > { %6512 = vmatprep.subr.msk.bf16.mxu0 %vm196_vm1, %v5471_v15  ;;  %6483 = vmatmul.mubr.msk.bf16.vlgmr.msra.gmra.mrb[4].mxu1 %vm192_vm2, %v8544_v32  ;;  %v5186_v32 = vsel %vm196_vm1, %v5172_v28, 0 }
 0x243   : > { %5066 = vmatpush1.bf16.msra.mxu1 %v5013_v10  ;;  %5097 = vmatprep.mubr.bf16.mxu1 %v8841_v18 }
 0x244   : > { %6496 = vmatprep.subr.msk.bf16.mxu1 %vm196_vm1, %v5173_v41 }
 0x248   : > { %6509 = vmatmul.mubr.msk.bf16.vlgmr.msra.gmra.mrb[0].mxu0 %vm192_vm2, %v8685_v51 }
 0x249   : > { %5561 = vmatpush1.bf16.msra.mxu0 %v697_v27  ;;  %5592 = vmatprep.mubr.bf16.mxu0 %v8841_v18 }
 0x24a   : > { %6515 = vmatprep.subr.msk.bf16.mxu0 %vm196_vm1, %v7583_v30  ;;  %v5611_v30 = vsel %vm844_vm7, %v7409_v25, %v5610_v16  ;;  %v518_v25 = vsel %vm196_vm1, %v7341_v62, 0 }
 0x24e   : > { %6490 = vmatmul.mubr.msk.bf16.vlgmr.msra.gmra.mrb[4].mxu1 %vm192_vm2, %v8581_v57  ;;  %v5751_v57 = vsel %vm1017_vm10, %v7552_v22, %v5750_v21 }
 0x24f   : > { %5239 = vmatpush1.bf16.msra.mxu1 %v5186_v32  ;;  %5270 = vmatprep.mubr.bf16.mxu1 %v8841_v18 }
 0x250   : > { %6513 = vmatmul.mubr.msk.bf16.vlgmr.msra.gmra.mrb[4].mxu0 %vm192_vm2, %v8685_v51  ;;  %6503 = vmatprep.subr.msk.bf16.mxu1 %vm196_vm1, %v7402_v23  ;;  %v870_v23 = vsel %vm196_vm1, %v7605_v1, 0  ;;  %v5892_v1 = vpop.permute.xlu0 %5891 }
 0x251   : > { %5619 = vmatpush1.bf16.msra.mxu0 %v858_v48  ;;  %5650 = vmatprep.mubr.bf16.mxu0 %v8841_v18  ;;  %v5905_v22 = vsel %vm5903_vm3, %v5892_v1, %v8733_v50  ;;  %v5904_v19 = vsel %vm5903_vm3, %v5890_v49, %v5892_v1 }
 0x252   : > { %6519 = vmatprep.subr.msk.bf16.mxu0 %vm196_vm1, %v5611_v30  ;;  %v5914_v35 = vsel %vm196_vm1, %v5904_v19, 0 }
 0x254   : > { %v5898_v62 = vpop.permute.xlu0 %5897 }
 0x258   : > { %6516 = vmatmul.mubr.msk.bf16.vlgmr.msra.gmra.mrb[0].mxu0 %vm192_vm2, %v8713_v33  ;;  %v5902_v2 = vpop.permute.xlu0 %5901 }
 0x259   : > { %5701 = vmatpush1.bf16.msra.mxu0 %v870_v23  ;;  %5732 = vmatprep.mubr.bf16.mxu0 %v8841_v18 }
 0x25a   : > { %6522 = vmatprep.subr.msk.bf16.mxu0 %vm196_vm1, %v7694_v45  ;;  %6497 = vmatmul.mubr.msk.bf16.vlgmr.msra.gmra.mrb[4].mxu1 %vm192_vm2, %v8615_v12  ;;  %v1031_v45 = vsel %vm196_vm1, %v7638_v24, 0  ;;  %v691_v24 = vsel %vm196_vm1, %v7452_v36, 0 }
 0x25b   : > { %5380 = vmatpush1.bf16.msra.mxu1 %v518_v25  ;;  %5411 = vmatprep.mubr.bf16.mxu1 %v8841_v18 }
 0x25c   : > { %6510 = vmatprep.subr.msk.bf16.mxu1 %vm196_vm1, %v7512_v60  ;;  %v5900_v60 = vpop.permute.xlu1 %5899  ;;  %v6063_v34 = vpop.permute.xlu0 %6062 }
 0x25d   : > { %v5909_v8 = vsel %vm5903_vm3, %v5900_v60, %v5902_v2  ;;  %v5908_v52 = vsel %vm5903_vm3, %v5898_v62, %v5900_v60 }
 0x25e   : > { %v5926_v4 = vsel %vm196_vm1, %v5908_v52, 0 }
 0x260   : > { %6520 = vmatmul.mubr.msk.bf16.vlgmr.msra.gmra.mrb[4].mxu0 %vm192_vm2, %v8713_v33  ;;  %v5896_v36 = vpop.permute.xlu1 %5895  ;;  %v6067_v12 = vpop.permute.xlu0 %6066 }
 0x261   : > { %5759 = vmatpush1.bf16.msra.mxu0 %v1031_v45  ;;  %5790 = vmatprep.mubr.bf16.mxu0 %v8841_v18  ;;  %v5907_v47 = vsel %vm5903_vm3, %v5896_v36, %v5898_v62  ;;  %v5906_v43 = vsel %vm5903_vm3, %v8733_v50, %v5896_v36 }
 0x262   : > { %6526 = vmatprep.subr.msk.bf16.mxu0 %vm196_vm1, %v5751_v57  ;;  %v5920_v44 = vsel %vm196_vm1, %v5906_v43, 0 }
 0x264   : > { %v6065_v59 = vpop.permute.xlu1 %6064  ;;  %v6073_v61 = vpop.permute.xlu0 %6072 }
 0x265   : > { %v6078_v38 = vsel %vm6076_vm5, %v6065_v59, %v6067_v12  ;;  %v6077_v11 = vsel %vm6076_vm5, %v6063_v34, %v6065_v59 }
 0x266   : > { %6504 = vmatmul.mubr.msk.bf16.vlgmr.msra.gmra.mrb[4].mxu1 %vm192_vm2, %v8647_v39  ;;  %v6087_v39 = vsel %vm196_vm1, %v6077_v11, 0 }
 0x267   : > { %5520 = vmatpush1.bf16.msra.mxu1 %v691_v24  ;;  %5551 = vmatprep.mubr.bf16.mxu1 %v8841_v18 }
 0x268   : > { %6523 = vmatmul.mubr.msk.bf16.vlgmr.msra.gmra.mrb[0].mxu0 %vm192_vm2, %v8742_v37  ;;  %6517 = vmatprep.subr.msk.bf16.mxu1 %vm196_vm1, %v8842_v9  ;;  %v6071_v6 = vpop.permute.xlu1 %6070  ;;  %v6069_v40 = vpop.permute.xlu0 %6068 }
 0x269   : > { %5841 = vmatpush1.bf16.msra.mxu0 %v1043_v0  ;;  %5872 = vmatprep.mubr.bf16.mxu0 %v8841_v18  ;;  %v6081_v63 = vsel %vm6076_vm5, %v6071_v6, %v6073_v61  ;;  %v6080_v26 = vsel %vm6076_vm5, %v6069_v40, %v6071_v6  ;;  %v6079_v5 = vsel %vm6076_vm5, %v6067_v12, %v6069_v40 }
 0x26a   : > { %6529 = vmatprep.subr.msk.bf16.mxu0 %vm196_vm1, %v5905_v22  ;;  %v6099_v56 = vsel %vm196_vm1, %v6081_v63, 0  ;;  %v6093_v15 = vsel %vm196_vm1, %v6079_v5, 0 }
 0x26c   : > { %v6075_v46 = vpop.permute.xlu1 %6074 }
 0x26d   : > { %v6082_v54 = vsel %vm6076_vm5, %v6073_v61, %v6075_v46 }
 0x270   : > { %6527 = vmatmul.mubr.msk.bf16.vlgmr.msra.gmra.mrb[4].mxu0 %vm192_vm2, %v8742_v37 }
 0x271   : > { %5932 = vmatpush1.bf16.msra.mxu0 %v5914_v35  ;;  %5963 = vmatprep.mubr.bf16.mxu0 %v8841_v18 }
 0x272   : > { %6511 = vmatmul.mubr.msk.bf16.vlgmr.msra.gmra.mrb[4].mxu1 %vm192_vm2, %v8685_v51  ;;  %6533 = vmatprep.subr.msk.bf16.mxu0 %vm196_vm1, %v5909_v8 }
 0x273   : > { %5660 = vmatpush1.bf16.msra.mxu1 %v864_v55  ;;  %5691 = vmatprep.mubr.bf16.mxu1 %v8841_v18 }
 0x274   : > { %6524 = vmatprep.subr.msk.bf16.mxu1 %vm196_vm1, %v8844_v17 }
 0x278   : > { %6530 = vmatmul.mubr.msk.bf16.vlgmr.msra.gmra.mrb[0].mxu0 %vm192_vm2, %v6528_v31 }
 0x279   : > { %6014 = vmatpush1.bf16.msra.mxu0 %v5926_v4  ;;  %6045 = vmatprep.mubr.bf16.mxu0 %v8841_v18 }
 0x27a   : > { %6536 = vmatprep.subr.msk.bf16.mxu0 %vm196_vm1, %v6078_v38 }
 0x27e   : > { %6518 = vmatmul.mubr.msk.bf16.vlgmr.msra.gmra.mrb[4].mxu1 %vm192_vm2, %v8713_v33 }
 0x27f   : > { %5800 = vmatpush1.bf16.msra.mxu1 %v1037_v20  ;;  %5831 = vmatprep.mubr.bf16.mxu1 %v8841_v18 }
 0x280   : > { %6534 = vmatmul.mubr.msk.bf16.vlgmr.msra.gmra.mrb[4].mxu0 %vm192_vm2, %v6528_v31  ;;  %6531 = vmatprep.subr.msk.bf16.mxu1 %vm196_vm1, %v5907_v47 }
 0x281   : > { %6105 = vmatpush1.bf16.msra.mxu0 %v6087_v39  ;;  %6136 = vmatprep.mubr.bf16.mxu0 %v8841_v18 }
 0x282   : > { %6540 = vmatprep.subr.msk.bf16.mxu0 %vm196_vm1, %v6082_v54 }
 0x288   : > { %6537 = vmatmul.mubr.msk.bf16.vlgmr.msra.gmra.mrb[0].mxu0 %vm192_vm2, %v6535_v42 }
 0x289   : > { %6187 = vmatpush1.bf16.msra.mxu0 %v6099_v56  ;;  %6218 = vmatprep.mubr.bf16.mxu0 %v8841_v18 }
 0x28a   : > { %6525 = vmatmul.mubr.msk.bf16.vlgmr.msra.gmra.mrb[4].mxu1 %vm192_vm2, %v8742_v37 }
 0x28b   : > { %5973 = vmatpush1.bf16.msra.mxu1 %v5920_v44  ;;  %6004 = vmatprep.mubr.bf16.mxu1 %v8841_v18 }
 0x28c   : > { %6538 = vmatprep.subr.msk.bf16.mxu1 %vm196_vm1, %v6080_v26 }
 0x290   : > { %6541 = vmatmul.mubr.msk.bf16.vlgmr.msra.gmra.mrb[4].mxu0 %vm192_vm2, %v6535_v42 }
 0x296   : > { %6532 = vmatmul.mubr.msk.bf16.vlgmr.msra.gmra.mrb[4].mxu1 %vm192_vm2, %v6528_v31 }
 0x297   : > { %6146 = vmatpush1.bf16.msra.mxu1 %v6093_v15  ;;  %6177 = vmatprep.mubr.bf16.mxu1 %v8841_v18 }
 0x2a2   : > { %6539 = vmatmul.mubr.msk.bf16.vlgmr.msra.gmra.mrb[4].mxu1 %vm192_vm2, %v6535_v42 }
 0x35b   : > { %v6138_v10 = vpop.f32.mrb[0].mxu0 }
 0x35c   : > { %v6544_v14 = vadd.f32 %v6138_v10, %v8610_v7  ;;  %v6140_v41 = vpop.f32.mrb[1].mxu0 }
 0x35d   : > { %v6545_v51 = vadd.f32 %v6140_v41, %v8618_v58  ;;  %v6142_v27 = vpop.f32.mrb[2].mxu0 }
 0x35e   : > { %6233 = vst [vmem:[%s123_s3] sm:$0xff] %v6544_v14  ;;  %v6143_v18 = vpop.f32.mrb[3].mxu0 }
 0x35f   : > { %6234 = vst [vmem:[%s123_s3 + $0x8] sm:$0xff] %v6545_v51 }
 0x363   : > { %v6220_v28 = vpop.f32.mrb[4].mxu0 }
 0x364   : > { %v6546_v32 = vadd.f32 %v6220_v28, %v8642_v13  ;;  %v6222_v16 = vpop.f32.mrb[5].mxu0 }
 0x365   : > { %v6547_v48 = vadd.f32 %v6222_v16, %v8650_v53  ;;  %v6224_v30 = vpop.f32.mrb[6].mxu0 }
 0x366   : > { %6237 = vst [vmem:[%s123_s3 + $0x20] sm:$0xff] %v6546_v32  ;;  %v6225_v33 = vpop.f32.mrb[7].mxu0 }
 0x367   : > { %6238 = vst [vmem:[%s123_s3 + $0x28] sm:$0xff] %v6547_v48 }
 0x375   : > { %v6179_v21 = vpop.f32.mrb[4].mxu1 }
 0x376   : > { %6235 = vst [vmem:[%s123_s3 + $0x10] sm:$0xff] %v6179_v21  ;;  %v6181_v7 = vpop.f32.mrb[5].mxu1 }
 0x377   : > { %6236 = vst [vmem:[%s123_s3 + $0x18] sm:$0xff] %v6181_v7  ;;  %v6183_v23 = vpop.f32.mrb[6].mxu1 }
 0x378   : > { %v6184_v58 = vpop.f32.mrb[7].mxu1 }
 0x379 PF: > { %s12_s9 = sadd.s32 1, %s7009_s9  }
 0x37a   : > { %p9_p4 = scmp.ge.s32.totalorder %s12_s9, 4  }
 0x37c   :  { %11 = sbr.rel (!%p9_p4) target bundleno = 1 (0x1), region = 91 }

</bundles_post_ra>
